<compile_context>
chip_gen: v5e
topology: v5e:2x2
jax: 0.10.0
libtpu: 0.0.40
codegen_flags: <defaults>
</compile_context>

<pallas_src>
import functools

import jax
import jax.numpy as jnp
from jax.experimental import pallas as pl
from jax.experimental.pallas import tpu as pltpu

D_MODEL = 128
NUM_HEADS = 4
HEAD_DIM = D_MODEL // NUM_HEADS
D_FF = 256
N_CLASSES = 5
VOCAB = 20000
VOCAB2 = 5
PREFIX_LEN = 6
LN_EPS = 1e-5


def _layernorm(x, g, b):
    mu = jnp.mean(x, axis=-1, keepdims=True)
    var = jnp.mean(jnp.square(x - mu), axis=-1, keepdims=True)
    return (x - mu) * jax.lax.rsqrt(var + LN_EPS) * g + b


def tf_output_kernel(x_ref,
                     wqkv_ref, bqkv_ref, wo_ref,
                     w1_ref, b1_ref, w2_ref, wout_ref,
                     vecs_ref, mask_ref,
                     out_ref, *, bb, s_pad):
    # TODO(synk): tf_layer/output_layer are None in the reference; this kernel
    # implements the substituted transformer-encoder-layer + linear head.
    vecs = vecs_ref[...]                        # (7, 128) packed small vectors
    bo, g1, be1 = vecs[0:1], vecs[1:2], vecs[2:3]
    b2, g2, be2 = vecs[3:4], vecs[4:5], vecs[5:6]
    bout = vecs[6:7]

    m = bb * s_pad
    # (bb, s_pad, 128) -> (bb*s_pad, 128): s_pad is a multiple of 8 so this is
    # a layout-preserving collapse of the leading dims.
    xf = x_ref[...].reshape(m, D_MODEL)         # f32 (kept for residual / LN)
    xbf = xf.astype(jnp.bfloat16)

    # ---- fused QKV projection: one bf16 (m,128)@(128,384) MXU op ----
    qkv = jnp.dot(xbf, wqkv_ref[...],
                  preferred_element_type=jnp.float32) + bqkv_ref[...]
    qb = qkv[:, 0:D_MODEL].reshape(bb, s_pad, D_MODEL)
    kb = qkv[:, D_MODEL:2 * D_MODEL].reshape(bb, s_pad, D_MODEL)
    vb = qkv[:, 2 * D_MODEL:3 * D_MODEL].reshape(bb, s_pad, D_MODEL)

    # precomputed additive key mask (-1e30 on padded key positions)
    key_mask = mask_ref[...].reshape(1, 1, s_pad)
    scale = 1.0 / (HEAD_DIM ** 0.5)

    # static unrolled head loop; contexts are concatenated along lanes and a
    # single K=128 matmul against Wo follows (no per-head K=32 matmuls).
    ctx_heads = []
    for h in range(NUM_HEADS):
        sl = slice(h * HEAD_DIM, (h + 1) * HEAD_DIM)
        qh = qb[:, :, sl].astype(jnp.bfloat16)
        kh = kb[:, :, sl].astype(jnp.bfloat16)
        vh = vb[:, :, sl].astype(jnp.bfloat16)
        # contract on last dims: no explicit kh.T (no XLU transpose)
        s = jnp.einsum('bqd,bkd->bqk', qh, kh,
                       preferred_element_type=jnp.float32) * scale + key_mask
        s = s - jnp.max(s, axis=-1, keepdims=True)
        p = jnp.exp(s)
        p = p * pl.reciprocal(jnp.sum(p, axis=-1, keepdims=True), approx=True)
        ctx_heads.append(jnp.einsum('bqk,bkd->bqd', p.astype(jnp.bfloat16), vh,
                                    preferred_element_type=jnp.float32))
    ctx = jnp.concatenate(ctx_heads, axis=-1).reshape(m, D_MODEL)
    attn = jnp.dot(ctx.astype(jnp.bfloat16), wo_ref[...],
                   preferred_element_type=jnp.float32) + bo

    # ---- residual + LayerNorm (post-LN, PyTorch default), f32 ----
    h1 = _layernorm(xf + attn, g1, be1)

    # ---- feed-forward ----
    f = jnp.dot(h1.astype(jnp.bfloat16), w1_ref[...],
                preferred_element_type=jnp.float32) + b1_ref[...]
    f = jnp.maximum(f, 0.0)
    f = jnp.dot(f.astype(jnp.bfloat16), w2_ref[...],
                preferred_element_type=jnp.float32) + b2

    h2 = _layernorm(h1 + f, g2, be2)

    # ---- lane-dense output head (wout zero-padded to 128 output lanes) ----
    out = jnp.dot(h2.astype(jnp.bfloat16), wout_ref[...],
                  preferred_element_type=jnp.float32) + bout
    out_ref[...] = out.reshape(bb, s_pad, D_MODEL)


def transformer_head(x, params):
    B, S, _ = x.shape
    s_pad = ((S + 7) // 8) * 8

    # bb heuristic: maximize per-step MXU M.  Split the batch into multiple
    # grid steps (v7x megacore) only when each step still gets >= ~256 rows;
    # otherwise a single step (VMEM footprint is ~1 MiB, far below limits).
    min_rows = 256
    if B * s_pad < 2 * min_rows:
        bb = B
    else:
        bb = min(B, max(32, pl.cdiv(min_rows, s_pad)))
    bb = max(bb, 1)
    b_pad = pl.cdiv(B, bb) * bb

    xp = jnp.pad(x, ((0, b_pad - B), (0, s_pad - S), (0, 0)))

    # host-precomputed additive key mask for padded positions
    key_mask = jnp.where(jnp.arange(s_pad) < S, 0.0, -1e30)
    key_mask = key_mask.astype(jnp.float32)[None, :]            # (1, s_pad)

    weight_args = (params["wqkv"], params["bqkv"], params["wo"],
                   params["w1"], params["b1"], params["w2"],
                   params["wout_p"], params["vecs"], key_mask)

    def full_spec(a):
        nd = a.ndim
        return pl.BlockSpec(a.shape, lambda b, _nd=nd: (0,) * _nd)

    in_specs = [pl.BlockSpec((bb, s_pad, D_MODEL), lambda b: (b, 0, 0))]
    in_specs += [full_spec(a) for a in weight_args]
    out_spec = pl.BlockSpec((bb, s_pad, D_MODEL), lambda b: (b, 0, 0))

    kernel = functools.partial(tf_output_kernel, bb=bb, s_pad=s_pad)

    out = pl.pallas_call(
        kernel,
        out_shape=jax.ShapeDtypeStruct((b_pad, s_pad, D_MODEL), jnp.float32),
        grid_spec=pltpu.PrefetchScalarGridSpec(
            num_scalar_prefetch=0,
            grid=(b_pad // bb,),
            in_specs=in_specs,
            out_specs=out_spec,
        ),
        compiler_params=pltpu.CompilerParams(
            dimension_semantics=("parallel",)),
    )(xp, *weight_args)

    return out[:B, :S, :N_CLASSES]


def init_params(key):
    ks = jax.random.split(key, 10)

    def lin(k, fan_in, shape):
        # weights stored as (in, out) so the kernel does x @ W directly
        return jax.random.normal(k, shape, jnp.float32) / jnp.sqrt(fan_in)

    wq = lin(ks[2], D_MODEL, (D_MODEL, D_MODEL))
    wk = lin(ks[3], D_MODEL, (D_MODEL, D_MODEL))
    wv = lin(ks[4], D_MODEL, (D_MODEL, D_MODEL))
    wqkv = jnp.concatenate([wq, wk, wv], axis=1).astype(jnp.bfloat16)
    bqkv = jnp.zeros((1, 3 * D_MODEL), jnp.float32)

    wout = lin(ks[8], D_MODEL, (D_MODEL, N_CLASSES))
    wout_p = jnp.zeros((D_MODEL, D_MODEL), jnp.float32)
    wout_p = wout_p.at[:, :N_CLASSES].set(wout).astype(jnp.bfloat16)

    z = jnp.zeros((D_MODEL,), jnp.float32)
    o = jnp.ones((D_MODEL,), jnp.float32)
    # packed 128-wide vectors: bo, ln1_g, ln1_b, b2, ln2_g, ln2_b, bout
    vecs = jnp.stack([z, o, z, z, o, z, z], axis=0)              # (7, 128)

    return dict(
        emb=jax.random.normal(ks[0], (VOCAB, D_MODEL), jnp.float32) * 0.02,
        emb2=jax.random.normal(ks[1], (VOCAB2, D_MODEL), jnp.float32) * 0.02,
        wqkv=wqkv,
        bqkv=bqkv,
        wo=lin(ks[5], D_MODEL, (D_MODEL, D_MODEL)).astype(jnp.bfloat16),
        w1=lin(ks[6], D_MODEL, (D_MODEL, D_FF)).astype(jnp.bfloat16),
        b1=jnp.zeros((1, D_FF), jnp.float32),
        w2=lin(ks[7], D_FF, (D_FF, D_MODEL)).astype(jnp.bfloat16),
        wout_p=wout_p,
        vecs=vecs,
    )


@jax.jit
def net_forward(params, ids):
    B = ids.shape[0]
    ids2 = jnp.arange(PREFIX_LEN)[None]  # == torch.tensor([0,1,2,3,4,5])[None]
    # TODO(synk): index 5 is out of range for the 5-row emb2 table in the
    # reference (PyTorch would raise IndexError); we clip to the last row.
    token2 = jnp.take(params["emb2"], jnp.clip(ids2, 0, VOCAB2 - 1), axis=0)
    # TODO(synk): embedding gather + prefix concat kept in JAX (glue); could be
    # folded into the kernel via scalar-prefetch + pl.Element row gather.
    tokens = jnp.take(params["emb"], ids, axis=0)                # (B, S_ids, 128)
    # torch.cat along dim=1 requires matching batch (reference only works for
    # B==1); we tile the 6-token prefix across the batch for B > 1.
    token2 = jnp.broadcast_to(token2, (B, PREFIX_LEN, D_MODEL))
    new_tokens = jnp.concatenate([token2, tokens], axis=1)       # (B, 6+S_ids, 128)
    return transformer_head(new_tokens, params)


if __name__ == "__main__":
    key = jax.random.PRNGKey(0)
    k_params, k_ids = jax.random.split(key)
    params = init_params(k_params)

    B, S_IDS = 2, 8
    ids = jax.random.randint(k_ids, (B, S_IDS), 0, VOCAB, dtype=jnp.int32)

    out = net_forward(params, ids)
    out = jax.block_until_ready(out)
    assert out.shape == (B, S_IDS + PREFIX_LEN, N_CLASSES), out.shape
    print("KERNEL_OK")
</pallas_src>

<mosaic_0001>
module attributes {stable_mosaic.version = 11 : i64} {
  func.func @tf_output_kernel(%arg0: i32, %arg1: memref<2x16x128xf32, #tpu.memory_space<vmem>>, %arg2: memref<128x384xbf16, #tpu.memory_space<vmem>>, %arg3: memref<1x384xf32, #tpu.memory_space<vmem>>, %arg4: memref<128x128xbf16, #tpu.memory_space<vmem>>, %arg5: memref<128x256xbf16, #tpu.memory_space<vmem>>, %arg6: memref<1x256xf32, #tpu.memory_space<vmem>>, %arg7: memref<256x128xbf16, #tpu.memory_space<vmem>>, %arg8: memref<128x128xbf16, #tpu.memory_space<vmem>>, %arg9: memref<7x128xf32, #tpu.memory_space<vmem>>, %arg10: memref<1x16xf32, #tpu.memory_space<vmem>>, %arg11: memref<2x16x128xf32, #tpu.memory_space<vmem>>) attributes {dimension_semantics = [#tpu.dimension_semantics<parallel>], iteration_bounds = array<i64: 1>, scalar_prefetch = 0 : i64, scratch_operands = 0 : i64, tpu.core_type = #tpu.core_type<tc>, window_params = [{transform_indices = @transform_0, window_bounds = array<i64: 2, 16, 128>}, {pipeline_mode = #tpu.pipeline_mode<synchronous>, transform_indices = @transform_1, window_bounds = array<i64: 128, 384>}, {pipeline_mode = #tpu.pipeline_mode<synchronous>, transform_indices = @transform_2, window_bounds = array<i64: 1, 384>}, {pipeline_mode = #tpu.pipeline_mode<synchronous>, transform_indices = @transform_3, window_bounds = array<i64: 128, 128>}, {pipeline_mode = #tpu.pipeline_mode<synchronous>, transform_indices = @transform_4, window_bounds = array<i64: 128, 256>}, {pipeline_mode = #tpu.pipeline_mode<synchronous>, transform_indices = @transform_5, window_bounds = array<i64: 1, 256>}, {pipeline_mode = #tpu.pipeline_mode<synchronous>, transform_indices = @transform_6, window_bounds = array<i64: 256, 128>}, {pipeline_mode = #tpu.pipeline_mode<synchronous>, transform_indices = @transform_7, window_bounds = array<i64: 128, 128>}, {pipeline_mode = #tpu.pipeline_mode<synchronous>, transform_indices = @transform_8, window_bounds = array<i64: 7, 128>}, {pipeline_mode = #tpu.pipeline_mode<synchronous>, transform_indices = @transform_9, window_bounds = array<i64: 1, 16>}, {transform_indices = @transform_10, window_bounds = array<i64: 2, 16, 128>}]} {
    %c0 = arith.constant 0 : index
    %c0_0 = arith.constant 0 : index
    %0 = vector.load %arg9[%c0, %c0_0] : memref<7x128xf32, #tpu.memory_space<vmem>>, vector<7x128xf32>
    %1 = vector.extract_strided_slice %0 {offsets = [0, 0], sizes = [1, 128], strides = [1, 1]} : vector<7x128xf32> to vector<1x128xf32>
    %2 = vector.extract_strided_slice %0 {offsets = [1, 0], sizes = [1, 128], strides = [1, 1]} : vector<7x128xf32> to vector<1x128xf32>
    %3 = vector.extract_strided_slice %0 {offsets = [2, 0], sizes = [1, 128], strides = [1, 1]} : vector<7x128xf32> to vector<1x128xf32>
    %4 = vector.extract_strided_slice %0 {offsets = [3, 0], sizes = [1, 128], strides = [1, 1]} : vector<7x128xf32> to vector<1x128xf32>
    %5 = vector.extract_strided_slice %0 {offsets = [4, 0], sizes = [1, 128], strides = [1, 1]} : vector<7x128xf32> to vector<1x128xf32>
    %6 = vector.extract_strided_slice %0 {offsets = [5, 0], sizes = [1, 128], strides = [1, 1]} : vector<7x128xf32> to vector<1x128xf32>
    %7 = vector.extract_strided_slice %0 {offsets = [6, 0], sizes = [1, 128], strides = [1, 1]} : vector<7x128xf32> to vector<1x128xf32>
    %c0_1 = arith.constant 0 : index
    %c0_2 = arith.constant 0 : index
    %c0_3 = arith.constant 0 : index
    %8 = vector.load %arg1[%c0_1, %c0_2, %c0_3] : memref<2x16x128xf32, #tpu.memory_space<vmem>>, vector<2x16x128xf32>
    %9 = vector.shape_cast %8 : vector<2x16x128xf32> to vector<32x128xf32>
    %10 = arith.truncf %9 : vector<32x128xf32> to vector<32x128xbf16>
    %c0_4 = arith.constant 0 : index
    %c0_5 = arith.constant 0 : index
    %11 = vector.load %arg2[%c0_4, %c0_5] : memref<128x384xbf16, #tpu.memory_space<vmem>>, vector<128x384xbf16>
    %cst = arith.constant dense<0.000000e+00> : vector<32x384xf32>
    %12 = tpu.matmul %10, %11, %cst {dimension_numbers = #tpu.dot_dimension_numbers<[1], [0], [0], [1], [0, 0, 1, 1], [], []>} : vector<32x128xbf16>, vector<128x384xbf16>, vector<32x384xf32> -> vector<32x384xf32>
    %c0_6 = arith.constant 0 : index
    %c0_7 = arith.constant 0 : index
    %13 = vector.load %arg3[%c0_6, %c0_7] : memref<1x384xf32, #tpu.memory_space<vmem>>, vector<1x384xf32>
    %14 = vector.broadcast %13 : vector<1x384xf32> to vector<32x384xf32>
    %15 = arith.addf %12, %14 : vector<32x384xf32>
    %16 = vector.extract_strided_slice %15 {offsets = [0, 0], sizes = [32, 128], strides = [1, 1]} : vector<32x384xf32> to vector<32x128xf32>
    %17 = vector.shape_cast %16 : vector<32x128xf32> to vector<2x16x128xf32>
    %18 = vector.extract_strided_slice %15 {offsets = [0, 128], sizes = [32, 128], strides = [1, 1]} : vector<32x384xf32> to vector<32x128xf32>
    %19 = vector.shape_cast %18 : vector<32x128xf32> to vector<2x16x128xf32>
    %20 = vector.extract_strided_slice %15 {offsets = [0, 256], sizes = [32, 128], strides = [1, 1]} : vector<32x384xf32> to vector<32x128xf32>
    %21 = vector.shape_cast %20 : vector<32x128xf32> to vector<2x16x128xf32>
    %c0_8 = arith.constant 0 : index
    %c0_9 = arith.constant 0 : index
    %22 = vector.load %arg10[%c0_8, %c0_9] : memref<1x16xf32, #tpu.memory_space<vmem>>, vector<1x16xf32>
    %23 = vector.shape_cast %22 : vector<1x16xf32> to vector<1x1x16xf32>
    %24 = vector.extract_strided_slice %17 {offsets = [0, 0, 0], sizes = [2, 16, 32], strides = [1, 1, 1]} : vector<2x16x128xf32> to vector<2x16x32xf32>
    %25 = arith.truncf %24 : vector<2x16x32xf32> to vector<2x16x32xbf16>
    %26 = vector.extract_strided_slice %19 {offsets = [0, 0, 0], sizes = [2, 16, 32], strides = [1, 1, 1]} : vector<2x16x128xf32> to vector<2x16x32xf32>
    %27 = arith.truncf %26 : vector<2x16x32xf32> to vector<2x16x32xbf16>
    %28 = vector.extract_strided_slice %21 {offsets = [0, 0, 0], sizes = [2, 16, 32], strides = [1, 1, 1]} : vector<2x16x128xf32> to vector<2x16x32xf32>
    %29 = arith.truncf %28 : vector<2x16x32xf32> to vector<2x16x32xbf16>
    "tpu.trace_start"() <{level = 10 : i32, message = "bqd,bkd->bqk"}> : () -> ()
    %cst_10 = arith.constant dense<0.000000e+00> : vector<2x16x16xf32>
    %30 = tpu.matmul %25, %27, %cst_10 {dimension_numbers = #tpu.dot_dimension_numbers<[2], [2], [1], [1], [0, 0, 0, 1, 1, 1], [0], [0]>} : vector<2x16x32xbf16>, vector<2x16x32xbf16>, vector<2x16x16xf32> -> vector<2x16x16xf32>
    "tpu.trace_stop"() : () -> ()
    %cst_11 = arith.constant 0.176776692 : f32
    %31 = vector.broadcast %cst_11 : f32 to vector<2x16x16xf32>
    %32 = arith.mulf %30, %31 : vector<2x16x16xf32>
    %33 = vector.broadcast %23 : vector<1x1x16xf32> to vector<2x16x16xf32>
    %34 = arith.addf %32, %33 : vector<2x16x16xf32>
    %cst_12 = arith.constant dense<0xFF800000> : vector<2x16xf32>
    %35 = vector.multi_reduction <maximumf>, %34, %cst_12 [2] : vector<2x16x16xf32> to vector<2x16xf32>
    %36 = vector.shape_cast %35 : vector<2x16xf32> to vector<2x16x1xf32>
    %37 = vector.broadcast %36 : vector<2x16x1xf32> to vector<2x16x16xf32>
    %38 = arith.subf %34, %37 : vector<2x16x16xf32>
    %39 = math.exp %38 : vector<2x16x16xf32>
    %cst_13 = arith.constant dense<0.000000e+00> : vector<2x16xf32>
    %40 = vector.multi_reduction <add>, %39, %cst_13 [2] : vector<2x16x16xf32> to vector<2x16xf32>
    %41 = vector.shape_cast %40 : vector<2x16xf32> to vector<2x16x1xf32>
    %42 = tpu.reciprocal %41 {approx = true} : vector<2x16x1xf32> -> vector<2x16x1xf32>
    %43 = vector.broadcast %42 : vector<2x16x1xf32> to vector<2x16x16xf32>
    %44 = arith.mulf %39, %43 : vector<2x16x16xf32>
    %45 = arith.truncf %44 : vector<2x16x16xf32> to vector<2x16x16xbf16>
    "tpu.trace_start"() <{level = 10 : i32, message = "bqk,bkd->bqd"}> : () -> ()
    %cst_14 = arith.constant dense<0.000000e+00> : vector<2x16x32xf32>
    %46 = tpu.matmul %45, %29, %cst_14 {dimension_numbers = #tpu.dot_dimension_numbers<[2], [1], [1], [2], [0, 0, 0, 1, 1, 2], [0], [0]>} : vector<2x16x16xbf16>, vector<2x16x32xbf16>, vector<2x16x32xf32> -> vector<2x16x32xf32>
    "tpu.trace_stop"() : () -> ()
    %47 = vector.extract_strided_slice %17 {offsets = [0, 0, 32], sizes = [2, 16, 32], strides = [1, 1, 1]} : vector<2x16x128xf32> to vector<2x16x32xf32>
    %48 = arith.truncf %47 : vector<2x16x32xf32> to vector<2x16x32xbf16>
    %49 = vector.extract_strided_slice %19 {offsets = [0, 0, 32], sizes = [2, 16, 32], strides = [1, 1, 1]} : vector<2x16x128xf32> to vector<2x16x32xf32>
    %50 = arith.truncf %49 : vector<2x16x32xf32> to vector<2x16x32xbf16>
    %51 = vector.extract_strided_slice %21 {offsets = [0, 0, 32], sizes = [2, 16, 32], strides = [1, 1, 1]} : vector<2x16x128xf32> to vector<2x16x32xf32>
    %52 = arith.truncf %51 : vector<2x16x32xf32> to vector<2x16x32xbf16>
    "tpu.trace_start"() <{level = 10 : i32, message = "bqd,bkd->bqk"}> : () -> ()
    %cst_15 = arith.constant dense<0.000000e+00> : vector<2x16x16xf32>
    %53 = tpu.matmul %48, %50, %cst_15 {dimension_numbers = #tpu.dot_dimension_numbers<[2], [2], [1], [1], [0, 0, 0, 1, 1, 1], [0], [0]>} : vector<2x16x32xbf16>, vector<2x16x32xbf16>, vector<2x16x16xf32> -> vector<2x16x16xf32>
    "tpu.trace_stop"() : () -> ()
    %cst_16 = arith.constant 0.176776692 : f32
    %54 = vector.broadcast %cst_16 : f32 to vector<2x16x16xf32>
    %55 = arith.mulf %53, %54 : vector<2x16x16xf32>
    %56 = vector.broadcast %23 : vector<1x1x16xf32> to vector<2x16x16xf32>
    %57 = arith.addf %55, %56 : vector<2x16x16xf32>
    %cst_17 = arith.constant dense<0xFF800000> : vector<2x16xf32>
    %58 = vector.multi_reduction <maximumf>, %57, %cst_17 [2] : vector<2x16x16xf32> to vector<2x16xf32>
    %59 = vector.shape_cast %58 : vector<2x16xf32> to vector<2x16x1xf32>
    %60 = vector.broadcast %59 : vector<2x16x1xf32> to vector<2x16x16xf32>
    %61 = arith.subf %57, %60 : vector<2x16x16xf32>
    %62 = math.exp %61 : vector<2x16x16xf32>
    %cst_18 = arith.constant dense<0.000000e+00> : vector<2x16xf32>
    %63 = vector.multi_reduction <add>, %62, %cst_18 [2] : vector<2x16x16xf32> to vector<2x16xf32>
    %64 = vector.shape_cast %63 : vector<2x16xf32> to vector<2x16x1xf32>
    %65 = tpu.reciprocal %64 {approx = true} : vector<2x16x1xf32> -> vector<2x16x1xf32>
    %66 = vector.broadcast %65 : vector<2x16x1xf32> to vector<2x16x16xf32>
    %67 = arith.mulf %62, %66 : vector<2x16x16xf32>
    %68 = arith.truncf %67 : vector<2x16x16xf32> to vector<2x16x16xbf16>
    "tpu.trace_start"() <{level = 10 : i32, message = "bqk,bkd->bqd"}> : () -> ()
    %cst_19 = arith.constant dense<0.000000e+00> : vector<2x16x32xf32>
    %69 = tpu.matmul %68, %52, %cst_19 {dimension_numbers = #tpu.dot_dimension_numbers<[2], [1], [1], [2], [0, 0, 0, 1, 1, 2], [0], [0]>} : vector<2x16x16xbf16>, vector<2x16x32xbf16>, vector<2x16x32xf32> -> vector<2x16x32xf32>
    "tpu.trace_stop"() : () -> ()
    %70 = vector.extract_strided_slice %17 {offsets = [0, 0, 64], sizes = [2, 16, 32], strides = [1, 1, 1]} : vector<2x16x128xf32> to vector<2x16x32xf32>
    %71 = arith.truncf %70 : vector<2x16x32xf32> to vector<2x16x32xbf16>
    %72 = vector.extract_strided_slice %19 {offsets = [0, 0, 64], sizes = [2, 16, 32], strides = [1, 1, 1]} : vector<2x16x128xf32> to vector<2x16x32xf32>
    %73 = arith.truncf %72 : vector<2x16x32xf32> to vector<2x16x32xbf16>
    %74 = vector.extract_strided_slice %21 {offsets = [0, 0, 64], sizes = [2, 16, 32], strides = [1, 1, 1]} : vector<2x16x128xf32> to vector<2x16x32xf32>
    %75 = arith.truncf %74 : vector<2x16x32xf32> to vector<2x16x32xbf16>
    "tpu.trace_start"() <{level = 10 : i32, message = "bqd,bkd->bqk"}> : () -> ()
    %cst_20 = arith.constant dense<0.000000e+00> : vector<2x16x16xf32>
    %76 = tpu.matmul %71, %73, %cst_20 {dimension_numbers = #tpu.dot_dimension_numbers<[2], [2], [1], [1], [0, 0, 0, 1, 1, 1], [0], [0]>} : vector<2x16x32xbf16>, vector<2x16x32xbf16>, vector<2x16x16xf32> -> vector<2x16x16xf32>
    "tpu.trace_stop"() : () -> ()
    %cst_21 = arith.constant 0.176776692 : f32
    %77 = vector.broadcast %cst_21 : f32 to vector<2x16x16xf32>
    %78 = arith.mulf %76, %77 : vector<2x16x16xf32>
    %79 = vector.broadcast %23 : vector<1x1x16xf32> to vector<2x16x16xf32>
    %80 = arith.addf %78, %79 : vector<2x16x16xf32>
    %cst_22 = arith.constant dense<0xFF800000> : vector<2x16xf32>
    %81 = vector.multi_reduction <maximumf>, %80, %cst_22 [2] : vector<2x16x16xf32> to vector<2x16xf32>
    %82 = vector.shape_cast %81 : vector<2x16xf32> to vector<2x16x1xf32>
    %83 = vector.broadcast %82 : vector<2x16x1xf32> to vector<2x16x16xf32>
    %84 = arith.subf %80, %83 : vector<2x16x16xf32>
    %85 = math.exp %84 : vector<2x16x16xf32>
    %cst_23 = arith.constant dense<0.000000e+00> : vector<2x16xf32>
    %86 = vector.multi_reduction <add>, %85, %cst_23 [2] : vector<2x16x16xf32> to vector<2x16xf32>
    %87 = vector.shape_cast %86 : vector<2x16xf32> to vector<2x16x1xf32>
    %88 = tpu.reciprocal %87 {approx = true} : vector<2x16x1xf32> -> vector<2x16x1xf32>
    %89 = vector.broadcast %88 : vector<2x16x1xf32> to vector<2x16x16xf32>
    %90 = arith.mulf %85, %89 : vector<2x16x16xf32>
    %91 = arith.truncf %90 : vector<2x16x16xf32> to vector<2x16x16xbf16>
    "tpu.trace_start"() <{level = 10 : i32, message = "bqk,bkd->bqd"}> : () -> ()
    %cst_24 = arith.constant dense<0.000000e+00> : vector<2x16x32xf32>
    %92 = tpu.matmul %91, %75, %cst_24 {dimension_numbers = #tpu.dot_dimension_numbers<[2], [1], [1], [2], [0, 0, 0, 1, 1, 2], [0], [0]>} : vector<2x16x16xbf16>, vector<2x16x32xbf16>, vector<2x16x32xf32> -> vector<2x16x32xf32>
    "tpu.trace_stop"() : () -> ()
    %93 = vector.extract_strided_slice %17 {offsets = [0, 0, 96], sizes = [2, 16, 32], strides = [1, 1, 1]} : vector<2x16x128xf32> to vector<2x16x32xf32>
    %94 = arith.truncf %93 : vector<2x16x32xf32> to vector<2x16x32xbf16>
    %95 = vector.extract_strided_slice %19 {offsets = [0, 0, 96], sizes = [2, 16, 32], strides = [1, 1, 1]} : vector<2x16x128xf32> to vector<2x16x32xf32>
    %96 = arith.truncf %95 : vector<2x16x32xf32> to vector<2x16x32xbf16>
    %97 = vector.extract_strided_slice %21 {offsets = [0, 0, 96], sizes = [2, 16, 32], strides = [1, 1, 1]} : vector<2x16x128xf32> to vector<2x16x32xf32>
    %98 = arith.truncf %97 : vector<2x16x32xf32> to vector<2x16x32xbf16>
    "tpu.trace_start"() <{level = 10 : i32, message = "bqd,bkd->bqk"}> : () -> ()
    %cst_25 = arith.constant dense<0.000000e+00> : vector<2x16x16xf32>
    %99 = tpu.matmul %94, %96, %cst_25 {dimension_numbers = #tpu.dot_dimension_numbers<[2], [2], [1], [1], [0, 0, 0, 1, 1, 1], [0], [0]>} : vector<2x16x32xbf16>, vector<2x16x32xbf16>, vector<2x16x16xf32> -> vector<2x16x16xf32>
    "tpu.trace_stop"() : () -> ()
    %cst_26 = arith.constant 0.176776692 : f32
    %100 = vector.broadcast %cst_26 : f32 to vector<2x16x16xf32>
    %101 = arith.mulf %99, %100 : vector<2x16x16xf32>
    %102 = vector.broadcast %23 : vector<1x1x16xf32> to vector<2x16x16xf32>
    %103 = arith.addf %101, %102 : vector<2x16x16xf32>
    %cst_27 = arith.constant dense<0xFF800000> : vector<2x16xf32>
    %104 = vector.multi_reduction <maximumf>, %103, %cst_27 [2] : vector<2x16x16xf32> to vector<2x16xf32>
    %105 = vector.shape_cast %104 : vector<2x16xf32> to vector<2x16x1xf32>
    %106 = vector.broadcast %105 : vector<2x16x1xf32> to vector<2x16x16xf32>
    %107 = arith.subf %103, %106 : vector<2x16x16xf32>
    %108 = math.exp %107 : vector<2x16x16xf32>
    %cst_28 = arith.constant dense<0.000000e+00> : vector<2x16xf32>
    %109 = vector.multi_reduction <add>, %108, %cst_28 [2] : vector<2x16x16xf32> to vector<2x16xf32>
    %110 = vector.shape_cast %109 : vector<2x16xf32> to vector<2x16x1xf32>
    %111 = tpu.reciprocal %110 {approx = true} : vector<2x16x1xf32> -> vector<2x16x1xf32>
    %112 = vector.broadcast %111 : vector<2x16x1xf32> to vector<2x16x16xf32>
    %113 = arith.mulf %108, %112 : vector<2x16x16xf32>
    %114 = arith.truncf %113 : vector<2x16x16xf32> to vector<2x16x16xbf16>
    "tpu.trace_start"() <{level = 10 : i32, message = "bqk,bkd->bqd"}> : () -> ()
    %cst_29 = arith.constant dense<0.000000e+00> : vector<2x16x32xf32>
    %115 = tpu.matmul %114, %98, %cst_29 {dimension_numbers = #tpu.dot_dimension_numbers<[2], [1], [1], [2], [0, 0, 0, 1, 1, 2], [0], [0]>} : vector<2x16x16xbf16>, vector<2x16x32xbf16>, vector<2x16x32xf32> -> vector<2x16x32xf32>
    "tpu.trace_stop"() : () -> ()
    %116 = tpu.concatenate %46, %69, %92, %115 in 2 : vector<2x16x32xf32>, vector<2x16x32xf32>, vector<2x16x32xf32>, vector<2x16x32xf32> -> vector<2x16x128xf32>
    %117 = vector.shape_cast %116 : vector<2x16x128xf32> to vector<32x128xf32>
    %118 = arith.truncf %117 : vector<32x128xf32> to vector<32x128xbf16>
    %c0_30 = arith.constant 0 : index
    %c0_31 = arith.constant 0 : index
    %119 = vector.load %arg4[%c0_30, %c0_31] : memref<128x128xbf16, #tpu.memory_space<vmem>>, vector<128x128xbf16>
    %cst_32 = arith.constant dense<0.000000e+00> : vector<32x128xf32>
    %120 = tpu.matmul %118, %119, %cst_32 {dimension_numbers = #tpu.dot_dimension_numbers<[1], [0], [0], [1], [0, 0, 1, 1], [], []>} : vector<32x128xbf16>, vector<128x128xbf16>, vector<32x128xf32> -> vector<32x128xf32>
    %121 = vector.broadcast %1 : vector<1x128xf32> to vector<32x128xf32>
    %122 = arith.addf %120, %121 : vector<32x128xf32>
    %123 = arith.addf %9, %122 : vector<32x128xf32>
    %cst_33 = arith.constant dense<0.000000e+00> : vector<32xf32>
    %124 = vector.multi_reduction <add>, %123, %cst_33 [1] : vector<32x128xf32> to vector<32xf32>
    %125 = vector.shape_cast %124 : vector<32xf32> to vector<32x1xf32>
    %cst_34 = arith.constant 1.280000e+02 : f32
    %126 = vector.broadcast %cst_34 : f32 to vector<32x1xf32>
    %127 = arith.divf %125, %126 : vector<32x1xf32>
    %128 = vector.broadcast %127 : vector<32x1xf32> to vector<32x128xf32>
    %129 = arith.subf %123, %128 : vector<32x128xf32>
    %130 = arith.mulf %129, %129 : vector<32x128xf32>
    %cst_35 = arith.constant dense<0.000000e+00> : vector<32xf32>
    %131 = vector.multi_reduction <add>, %130, %cst_35 [1] : vector<32x128xf32> to vector<32xf32>
    %132 = vector.shape_cast %131 : vector<32xf32> to vector<32x1xf32>
    %cst_36 = arith.constant 1.280000e+02 : f32
    %133 = vector.broadcast %cst_36 : f32 to vector<32x1xf32>
    %134 = arith.divf %132, %133 : vector<32x1xf32>
    %135 = vector.broadcast %127 : vector<32x1xf32> to vector<32x128xf32>
    %136 = arith.subf %123, %135 : vector<32x128xf32>
    %cst_37 = arith.constant 9.99999974E-6 : f32
    %137 = vector.broadcast %cst_37 : f32 to vector<32x1xf32>
    %138 = arith.addf %134, %137 : vector<32x1xf32>
    %139 = math.rsqrt %138 : vector<32x1xf32>
    %140 = vector.broadcast %139 : vector<32x1xf32> to vector<32x128xf32>
    %141 = arith.mulf %136, %140 : vector<32x128xf32>
    %142 = vector.broadcast %2 : vector<1x128xf32> to vector<32x128xf32>
    %143 = arith.mulf %141, %142 : vector<32x128xf32>
    %144 = vector.broadcast %3 : vector<1x128xf32> to vector<32x128xf32>
    %145 = arith.addf %143, %144 : vector<32x128xf32>
    %146 = arith.truncf %145 : vector<32x128xf32> to vector<32x128xbf16>
    %c0_38 = arith.constant 0 : index
    %c0_39 = arith.constant 0 : index
    %147 = vector.load %arg5[%c0_38, %c0_39] : memref<128x256xbf16, #tpu.memory_space<vmem>>, vector<128x256xbf16>
    %cst_40 = arith.constant dense<0.000000e+00> : vector<32x256xf32>
    %148 = tpu.matmul %146, %147, %cst_40 {dimension_numbers = #tpu.dot_dimension_numbers<[1], [0], [0], [1], [0, 0, 1, 1], [], []>} : vector<32x128xbf16>, vector<128x256xbf16>, vector<32x256xf32> -> vector<32x256xf32>
    %c0_41 = arith.constant 0 : index
    %c0_42 = arith.constant 0 : index
    %149 = vector.load %arg6[%c0_41, %c0_42] : memref<1x256xf32, #tpu.memory_space<vmem>>, vector<1x256xf32>
    %150 = vector.broadcast %149 : vector<1x256xf32> to vector<32x256xf32>
    %151 = arith.addf %148, %150 : vector<32x256xf32>
    %cst_43 = arith.constant 0.000000e+00 : f32
    %152 = vector.broadcast %cst_43 : f32 to vector<32x256xf32>
    %153 = arith.maximumf %151, %152 : vector<32x256xf32>
    %154 = arith.truncf %153 : vector<32x256xf32> to vector<32x256xbf16>
    %c0_44 = arith.constant 0 : index
    %c0_45 = arith.constant 0 : index
    %155 = vector.load %arg7[%c0_44, %c0_45] : memref<256x128xbf16, #tpu.memory_space<vmem>>, vector<256x128xbf16>
    %cst_46 = arith.constant dense<0.000000e+00> : vector<32x128xf32>
    %156 = tpu.matmul %154, %155, %cst_46 {dimension_numbers = #tpu.dot_dimension_numbers<[1], [0], [0], [1], [0, 0, 1, 1], [], []>} : vector<32x256xbf16>, vector<256x128xbf16>, vector<32x128xf32> -> vector<32x128xf32>
    %157 = vector.broadcast %4 : vector<1x128xf32> to vector<32x128xf32>
    %158 = arith.addf %156, %157 : vector<32x128xf32>
    %159 = arith.addf %145, %158 : vector<32x128xf32>
    %cst_47 = arith.constant dense<0.000000e+00> : vector<32xf32>
    %160 = vector.multi_reduction <add>, %159, %cst_47 [1] : vector<32x128xf32> to vector<32xf32>
    %161 = vector.shape_cast %160 : vector<32xf32> to vector<32x1xf32>
    %cst_48 = arith.constant 1.280000e+02 : f32
    %162 = vector.broadcast %cst_48 : f32 to vector<32x1xf32>
    %163 = arith.divf %161, %162 : vector<32x1xf32>
    %164 = vector.broadcast %163 : vector<32x1xf32> to vector<32x128xf32>
    %165 = arith.subf %159, %164 : vector<32x128xf32>
    %166 = arith.mulf %165, %165 : vector<32x128xf32>
    %cst_49 = arith.constant dense<0.000000e+00> : vector<32xf32>
    %167 = vector.multi_reduction <add>, %166, %cst_49 [1] : vector<32x128xf32> to vector<32xf32>
    %168 = vector.shape_cast %167 : vector<32xf32> to vector<32x1xf32>
    %cst_50 = arith.constant 1.280000e+02 : f32
    %169 = vector.broadcast %cst_50 : f32 to vector<32x1xf32>
    %170 = arith.divf %168, %169 : vector<32x1xf32>
    %171 = vector.broadcast %163 : vector<32x1xf32> to vector<32x128xf32>
    %172 = arith.subf %159, %171 : vector<32x128xf32>
    %cst_51 = arith.constant 9.99999974E-6 : f32
    %173 = vector.broadcast %cst_51 : f32 to vector<32x1xf32>
    %174 = arith.addf %170, %173 : vector<32x1xf32>
    %175 = math.rsqrt %174 : vector<32x1xf32>
    %176 = vector.broadcast %175 : vector<32x1xf32> to vector<32x128xf32>
    %177 = arith.mulf %172, %176 : vector<32x128xf32>
    %178 = vector.broadcast %5 : vector<1x128xf32> to vector<32x128xf32>
    %179 = arith.mulf %177, %178 : vector<32x128xf32>
    %180 = vector.broadcast %6 : vector<1x128xf32> to vector<32x128xf32>
    %181 = arith.addf %179, %180 : vector<32x128xf32>
    %182 = arith.truncf %181 : vector<32x128xf32> to vector<32x128xbf16>
    %c0_52 = arith.constant 0 : index
    %c0_53 = arith.constant 0 : index
    %183 = vector.load %arg8[%c0_52, %c0_53] : memref<128x128xbf16, #tpu.memory_space<vmem>>, vector<128x128xbf16>
    %cst_54 = arith.constant dense<0.000000e+00> : vector<32x128xf32>
    %184 = tpu.matmul %182, %183, %cst_54 {dimension_numbers = #tpu.dot_dimension_numbers<[1], [0], [0], [1], [0, 0, 1, 1], [], []>} : vector<32x128xbf16>, vector<128x128xbf16>, vector<32x128xf32> -> vector<32x128xf32>
    %185 = vector.broadcast %7 : vector<1x128xf32> to vector<32x128xf32>
    %186 = arith.addf %184, %185 : vector<32x128xf32>
    %187 = vector.shape_cast %186 : vector<32x128xf32> to vector<2x16x128xf32>
    %c0_55 = arith.constant 0 : index
    %c0_56 = arith.constant 0 : index
    %c0_57 = arith.constant 0 : index
    %188 = vector.load %arg11[%c0_55, %c0_56, %c0_57] : memref<2x16x128xf32, #tpu.memory_space<vmem>>, vector<2x16x128xf32>
    tpu.vector_store %arg11[%c0_55, %c0_56, %c0_57], %187 {strides = array<i32>} : memref<2x16x128xf32, #tpu.memory_space<vmem>>, vector<2x16x128xf32>,
    return
  }
  func.func @transform_0(%arg0: i32) -> (i32, i32, i32) {
    %c0_i32 = arith.constant 0 : i32
    %c0_i32_0 = arith.constant 0 : i32
    %c0_i32_1 = arith.constant 0 : i32
    return %arg0, %c0_i32, %c0_i32_0 : i32, i32, i32
  }
  func.func @transform_1(%arg0: i32) -> (i32, i32) {
    %c0_i32 = arith.constant 0 : i32
    %c0_i32_0 = arith.constant 0 : i32
    %c0_i32_1 = arith.constant 0 : i32
    return %c0_i32, %c0_i32_0 : i32, i32
  }
  func.func @transform_2(%arg0: i32) -> (i32, i32) {
    %c0_i32 = arith.constant 0 : i32
    %c0_i32_0 = arith.constant 0 : i32
    %c0_i32_1 = arith.constant 0 : i32
    return %c0_i32, %c0_i32_0 : i32, i32
  }
  func.func @transform_3(%arg0: i32) -> (i32, i32) {
    %c0_i32 = arith.constant 0 : i32
    %c0_i32_0 = arith.constant 0 : i32
    %c0_i32_1 = arith.constant 0 : i32
    return %c0_i32, %c0_i32_0 : i32, i32
  }
  func.func @transform_4(%arg0: i32) -> (i32, i32) {
    %c0_i32 = arith.constant 0 : i32
    %c0_i32_0 = arith.constant 0 : i32
    %c0_i32_1 = arith.constant 0 : i32
    return %c0_i32, %c0_i32_0 : i32, i32
  }
  func.func @transform_5(%arg0: i32) -> (i32, i32) {
    %c0_i32 = arith.constant 0 : i32
    %c0_i32_0 = arith.constant 0 : i32
    %c0_i32_1 = arith.constant 0 : i32
    return %c0_i32, %c0_i32_0 : i32, i32
  }
  func.func @transform_6(%arg0: i32) -> (i32, i32) {
    %c0_i32 = arith.constant 0 : i32
    %c0_i32_0 = arith.constant 0 : i32
    %c0_i32_1 = arith.constant 0 : i32
    return %c0_i32, %c0_i32_0 : i32, i32
  }
  func.func @transform_7(%arg0: i32) -> (i32, i32) {
    %c0_i32 = arith.constant 0 : i32
    %c0_i32_0 = arith.constant 0 : i32
    %c0_i32_1 = arith.constant 0 : i32
    return %c0_i32, %c0_i32_0 : i32, i32
  }
  func.func @transform_8(%arg0: i32) -> (i32, i32) {
    %c0_i32 = arith.constant 0 : i32
    %c0_i32_0 = arith.constant 0 : i32
    %c0_i32_1 = arith.constant 0 : i32
    return %c0_i32, %c0_i32_0 : i32, i32
  }
  func.func @transform_9(%arg0: i32) -> (i32, i32) {
    %c0_i32 = arith.constant 0 : i32
    %c0_i32_0 = arith.constant 0 : i32
    %c0_i32_1 = arith.constant 0 : i32
    return %c0_i32, %c0_i32_0 : i32, i32
  }
  func.func @transform_10(%arg0: i32) -> (i32, i32, i32) {
    %c0_i32 = arith.constant 0 : i32
    %c0_i32_0 = arith.constant 0 : i32
    %c0_i32_1 = arith.constant 0 : i32
    return %arg0, %c0_i32, %c0_i32_0 : i32, i32, i32
  }
}

</mosaic_0001>

<bundles_post_ra>
// kernel: net_forward.1
= control target key start
LH: loop header
LB: loop body
LE: loop exit
PB: predicated region body
PF: predicated region fallthrough
CT: control target
= control target key end

     0   :  { %15 = vsyncpa [#allocation3], 0  ;;  %s2980_s0 = inlined_call_operand.vmem [shape: f32[2,16,128], index: 0, kind: input, shape index: {}]   ;;  %s2981_s1 = inlined_call_operand.hbm [shape: bf16[128,384], index: 1, kind: input, shape index: {}]   ;;  %s2982_s2 = inlined_call_operand.hbm [shape: f32[1,384], index: 2, kind: input, shape index: {}]   ;;  %s2983_s3 = inlined_call_operand.hbm [shape: bf16[128,128], index: 3, kind: input, shape index: {}]   ;;  %s2984_s4 = inlined_call_operand.hbm [shape: bf16[128,256], index: 4, kind: input, shape index: {}]   ;;  %s2985_s5 = inlined_call_operand.hbm [shape: f32[1,256], index: 5, kind: input, shape index: {}]   ;;  %s2986_s6 = inlined_call_operand.hbm [shape: bf16[256,128], index: 6, kind: input, shape index: {}]   ;;  %s2987_s7 = inlined_call_operand.hbm [shape: bf16[128,128], index: 7, kind: input, shape index: {}]   ;;  %s2988_s8 = inlined_call_operand.hbm [shape: f32[7,128], index: 8, kind: input, shape index: {}]   ;;  %s2989_s9 = inlined_call_operand.vmem [shape: f32[1,16], index: 9, kind: input, shape index: {}]   ;;  %s2990_s10 = inlined_call_operand.vmem [shape: f32[2,16,128], index: 10, kind: output, shape index: {}]  }
   0x1   :  { %16 = vsyncpa [#allocation5], 0 }
   0x2   :  { %17 = vsyncpa [#allocation8], 0 }
   0x3   :  { %18 = vsyncpa [#allocation11], 0  ;;  %s40_s15 = sshll.u32 %s2982_s2, 4  ;;  %s41_s15 = int_to_ptr.hbm [resolvable:$true] %s40_s15 }
   0x4   :  { %19 = vsyncpa [#allocation14], 0  ;;  %s2514_s16 = smov [#allocation4]   ;;  %s63_s20 = sshll.u32 %s2984_s4, 4  ;;  %s64_s20 = int_to_ptr.hbm [resolvable:$true] %s63_s20 }
   0x5   :  { %s42_s17 = sshll.u32 %s2514_s16, 4  ;;  %s2515_s21 = smov [#allocation7]   ;;  %s43_s17 = int_to_ptr.vmem [resolvable:$true] %s42_s17 }
   0x6   :  { %45 = dma.hbm_to_vmem [thread:$0]  %s41_s15, 48, %s43_s17, [#allocation5]  }
   0x7   :  { %s65_s22 = sshll.u32 %s2515_s21, 4  ;;  %s2516_s23 = smov 128   ;;  %s66_s22 = int_to_ptr.vmem [resolvable:$true] %s65_s22 }
   0x8   :  { %s2517_s24 = smov 8   ;;  %s87_s2 = sshll.u32 %s2986_s6, 4  ;;  %s88_s2 = int_to_ptr.hbm [resolvable:$true] %s87_s2 }
   0x9   :  { %71 = dma.hbm_to_vmem [thread:$0]  %s64_s20, 2048, %s66_s22, [#allocation8], %s2516_s23, %s2516_s23, %s2517_s24  }
   0xa   :  { %s2518_s27 = smov [#allocation10]   ;;  %s26_s4 = sshll.u32 %s2981_s1, 4  ;;  %s27_s4 = int_to_ptr.hbm [resolvable:$true] %s26_s4 }
   0xb   :  { %s89_s28 = sshll.u32 %s2518_s27, 4  ;;  %s2519_s11 = smov 64   ;;  %s90_s28 = int_to_ptr.vmem [resolvable:$true] %s89_s28 }
   0xc   :  { %s2520_s12 = smov 4   ;;  %s2521_s13 = smov [#allocation2]  }
   0xd   :  { %95 = dma.hbm_to_vmem [thread:$0]  %s88_s2, 2048, %s90_s28, [#allocation11], %s2519_s11, %s2519_s11, %s2520_s12  }
   0xe   :  { %s28_s14 = sshll.u32 %s2521_s13, 4  ;;  %s2522_s15 = smov 192   ;;  %s29_s14 = int_to_ptr.vmem [resolvable:$true] %s28_s14 }
   0xf   :  { %s2523_s6 = smov 12   ;;  %s50_s18 = sshll.u32 %s2983_s3, 4  ;;  %s51_s18 = int_to_ptr.hbm [resolvable:$true] %s50_s18 }
  0x10   :  { %34 = dma.hbm_to_vmem [thread:$0]  %s27_s4, 3072, %s29_s14, [#allocation3], %s2522_s15, %s2522_s15, %s2523_s6  }
  0x11   :  { %s2524_s19 = smov [#allocation6]   ;;  %s77_s22 = sshll.u32 %s2985_s5, 4  ;;  %s78_s22 = int_to_ptr.hbm [resolvable:$true] %s77_s22 }
  0x12   :  { %s52_s1 = sshll.u32 %s2524_s19, 4  ;;  %s2525_s23 = smov [#allocation9]   ;;  %s53_s1 = int_to_ptr.vmem [resolvable:$true] %s52_s1 }
  0x13   :  { %58 = dma.hbm_to_vmem [thread:$0]  %s51_s18, 1024, %s53_s1, [#allocation5], %s2519_s11, %s2519_s11, %s2520_s12  }
  0x14   :  { %s79_s24 = sshll.u32 %s2525_s23, 4  ;;  %s100_s2 = sshll.u32 %s2987_s7, 4  ;;  %s80_s24 = int_to_ptr.vmem [resolvable:$true] %s79_s24  ;;  %s101_s2 = int_to_ptr.hbm [resolvable:$true] %s100_s2 }
  0x15   :  { %82 = dma.hbm_to_vmem [thread:$0]  %s78_s22, 32, %s80_s24, [#allocation8]  }
  0x16   :  { %s114_s28 = sshll.u32 %s2988_s8, 4  ;;  %s2526_s29 = smov [#allocation12]   ;;  %s115_s28 = int_to_ptr.hbm [resolvable:$true] %s114_s28 }
  0x17   :  { %s102_s5 = sshll.u32 %s2526_s29, 4  ;;  %s2527_s30 = smov [#allocation13]   ;;  %s103_s5 = int_to_ptr.vmem [resolvable:$true] %s102_s5 }
  0x18   :  { %108 = dma.hbm_to_vmem [thread:$0]  %s101_s2, 1024, %s103_s5, [#allocation11], %s2519_s11, %s2519_s11, %s2520_s12  }
  0x19   :  { %s116_s4 = sshll.u32 %s2527_s30, 4  ;;  %s117_s4 = int_to_ptr.vmem [resolvable:$true] %s116_s4 }
  0x1a   :  { %119 = dma.hbm_to_vmem [thread:$0]  %s115_s28, 128, %s117_s4, [#allocation14]  }
  0x1b   :  { %2504 = dma.done.wait [#allocation3], 3072  }
  0x1c   :  { %2505 = vsyncadd [#allocation3], 4294964224 }
  0x1d   :  { %2506 = dma.done.wait [#allocation5], 1072  }
  0x1e   :  { %2507 = vsyncadd [#allocation5], 4294966224 }
  0x1f   :  { %2508 = dma.done.wait [#allocation8], 2080  }
  0x20   :  { %2509 = vsyncadd [#allocation8], 4294965216 }
  0x21   :  { %2510 = dma.done.wait [#allocation11], 3072  }
  0x22   :  { %2511 = vsyncadd [#allocation11], 4294964224 }
  0x23   :  { %2512 = dma.done.wait [#allocation14], 128  }
  0x24   :  { %2513 = vsyncadd [#allocation14], 4294967168  ;;  %v1888_v0 = vld [vmem:[#allocation2 + $0xa8] sm:$0xf]  ;;  %v2128_v1 = vld [vmem:[#allocation2 + $0xb0] sm:$0xf0] }
  0x25   :  { %v2127_v2 = vld [vmem:[#allocation2 + $0xac] sm:$0xf]  ;;  %v1889_v3 = vor.u32 %v2128_v1, %v1888_v0  ;;  %v1890_v4 = vld [vmem:[#allocation2 + $0xb4] sm:$0xf0]  ;;  %v1876_v5 = vld [vmem:[#allocation2 + $0x90] sm:$0xf] }
  0x26   :  { %v2125_v6 = vld [vmem:[#allocation2 + $0x98] sm:$0xf0]  ;;  %v1893_v7 = vor.u32 %v2127_v2, %v1890_v4  ;;  %v2124_v8 = vld [vmem:[#allocation2 + $0x94] sm:$0xf]  ;;  %v1878_v9 = vld [vmem:[#allocation2 + $0x9c] sm:$0xf0] }
  0x27   :  { %330 = vmatpush.bf16.msra.mxu0 %v1889_v3  ;;  %v1877_v10 = vor.u32 %v2125_v6, %v1876_v5  ;;  %v1881_v11 = vor.u32 %v2124_v8, %v1878_v9  ;;  %v1864_v12 = vld [vmem:[#allocation2 + $0x78] sm:$0xf]  ;;  %v2122_v13 = vld [vmem:[#allocation2 + $0x80] sm:$0xf0]  ;;  %v2121_v14 = vld [vmem:[#allocation2 + $0x7c] sm:$0xf] }
  0x28   :  { %349 = vmatpush.bf16.msra.mxu1 %v1893_v7  ;;  %v1866_v15 = vld [vmem:[#allocation2 + $0x84] sm:$0xf0]  ;;  %v1865_v16 = vor.u32 %v2122_v13, %v1864_v12  ;;  %v1852_v18 = vld [vmem:[#allocation2 + $0x60] sm:$0xf]  ;;  %v2119_v19 = vld [vmem:[#allocation2 + $0x68] sm:$0xf0] }
  0x29   :  { %v1869_v17 = vor.u32 %v2121_v14, %v1866_v15  ;;  %v2118_v20 = vld [vmem:[#allocation2 + $0x64] sm:$0xf]  ;;  %v1854_v21 = vld [vmem:[#allocation2 + $0x6c] sm:$0xf0]  ;;  %v1853_v22 = vor.u32 %v2119_v19, %v1852_v18  ;;  %v1840_v24 = vld [vmem:[#allocation2 + $0x48] sm:$0xf] }
  0x2a   :  { %v1857_v23 = vor.u32 %v2118_v20, %v1854_v21  ;;  %v2116_v25 = vld [vmem:[#allocation2 + $0x50] sm:$0xf0]  ;;  %v2115_v26 = vld [vmem:[#allocation2 + $0x4c] sm:$0xf]  ;;  %v1842_v27 = vld [vmem:[#allocation2 + $0x54] sm:$0xf0] }
  0x2b   :  { %331 = vmatpush.bf16.msra.mxu0 %v1877_v10  ;;  %v1841_v28 = vor.u32 %v2116_v25, %v1840_v24  ;;  %v1845_v29 = vor.u32 %v2115_v26, %v1842_v27  ;;  %v1828_v30 = vld [vmem:[#allocation2 + $0x30] sm:$0xf]  ;;  %v2113_v31 = vld [vmem:[#allocation2 + $0x38] sm:$0xf0]  ;;  %v2112_v32 = vld [vmem:[#allocation2 + $0x34] sm:$0xf] }
  0x2c   :  { %350 = vmatpush.bf16.msra.mxu1 %v1881_v11  ;;  %v1830_v33 = vld [vmem:[#allocation2 + $0x3c] sm:$0xf0]  ;;  %v1829_v34 = vor.u32 %v2113_v31, %v1828_v30  ;;  %v1816_v36 = vld [vmem:[#allocation2 + $0x18] sm:$0xf]  ;;  %v2110_v37 = vld [vmem:[#allocation2 + $0x20] sm:$0xf0] }
  0x2d   :  { %v1833_v35 = vor.u32 %v2112_v32, %v1830_v33  ;;  %v2109_v38 = vld [vmem:[#allocation2 + $0x1c] sm:$0xf]  ;;  %v1818_v39 = vld [vmem:[#allocation2 + $0x24] sm:$0xf0]  ;;  %v1817_v40 = vor.u32 %v2110_v37, %v1816_v36  ;;  %v1804_v42 = vld [vmem:[#allocation2] sm:$0xf] }
  0x2e   :  { %v1821_v41 = vor.u32 %v2109_v38, %v1818_v39  ;;  %v2107_v43 = vld [vmem:[#allocation2 + $0x8] sm:$0xf0]  ;;  %v2106_v44 = vld [vmem:[#allocation2 + $0x4] sm:$0xf]  ;;  %v1806_v45 = vld [vmem:[#allocation2 + $0xc] sm:$0xf0] }
  0x2f   :  { %332 = vmatpush.bf16.msra.mxu0 %v1865_v16  ;;  %v1805_v46 = vor.u32 %v2107_v43, %v1804_v42  ;;  %v156_v47 = vld [vmem:[%s2980_s0] sm:$0xff]  ;;  %v157_v48 = vld [vmem:[%s2980_s0 + $0x8] sm:$0xff]  ;;  %v1809_v49 = vor.u32 %v2106_v44, %v1806_v45  ;;  %v158_v51 = vld [vmem:[%s2980_s0 + $0x10] sm:$0xff]  ;;  %vm410_vm0 = vcmask 261120   ;;  %vm472_vm1 = vcmask 130048   ;;  %s2529_s19 = smov 32  }
  0x30   :  { %351 = vmatpush.bf16.msra.mxu1 %v1869_v17  ;;  %v2625_v50 = vpack.c.bf16 %v157_v48, %v156_v47  ;;  %v159_v52 = vld [vmem:[%s2980_s0 + $0x18] sm:$0xff]  ;;  %v2639_v54 = vld [vmem:[#allocation4] sm:$0x7]  ;;  %v2126_v39 = vld [vmem:[#allocation2 + $0xa0] sm:$0xf0]  ;;  %vm1091_vm2 = vcmask 523264  }
  0x31   :  { %v2635_v53 = vpack.c.bf16 %v159_v52, %v158_v51  ;;  %v197_v57 = vperm.slane %v2639_v54, 1  ;;  %v196_v59 = vperm.slane %v2639_v54, 0  ;;  %v2662_v31 = vld [vmem:[%s2989_s9] ss:$0 sm:$0xff]  ;;  %v1884_v36 = vld [vmem:[#allocation2 + $0x98] sm:$0xf] }
  0x32   :  { %v1872_v42 = vld [vmem:[#allocation2 + $0x80] sm:$0xf]  ;;  %v2123_v43 = vld [vmem:[#allocation2 + $0x88] sm:$0xf0]  ;;  %v1860_v47 = vld [vmem:[#allocation2 + $0x68] sm:$0xf] }
  0x33   :  { %333 = vmatpush.bf16.msra.mxu0 %v1853_v22  ;;  %v2120_v48 = vld [vmem:[#allocation2 + $0x70] sm:$0xf0]  ;;  %s2528_s9 = smov 96   ;;  %vm1096_vm3 = vcmask 785408  }
  0x34   :  { %352 = vmatpush.bf16.msra.mxu1 %v1857_v23  ;;  %v1861_v52 = vor.u32 %v2120_v48, %v1860_v47 }
  0x37   :  { %334 = vmatpush.bf16.msra.mxu0 %v1841_v28 }
  0x38   :  { %353 = vmatpush.bf16.msra.mxu1 %v1845_v29 }
  0x3b   :  { %335 = vmatpush.bf16.msra.mxu0 %v1829_v34  ;;  %v1896_v34 = vld [vmem:[#allocation2 + $0xb0] sm:$0xf] }
  0x3c   :  { %354 = vmatpush.bf16.msra.mxu1 %v1833_v35  ;;  %v2129_v35 = vld [vmem:[#allocation2 + $0xb8] sm:$0xf0] }
  0x3d   :  { %v1897_v38 = vor.u32 %v2129_v35, %v1896_v34  ;;  %v198_v34 = vperm.slane %v2639_v54, 2 }
  0x3f   :  { %336 = vmatpush.bf16.msra.mxu0 %v1817_v40  ;;  %368 = vmatpush.bf16.msra.mxu2 %v1897_v38 }
  0x40   :  { %355 = vmatpush.bf16.msra.mxu1 %v1821_v41  ;;  %v1885_v41 = vor.u32 %v2126_v39, %v1884_v36 }
  0x43   :  { %337 = vmatpush.bf16.msra.mxu0 %v1805_v46  ;;  %369 = vmatpush.bf16.msra.mxu2 %v1885_v41  ;;  %v1873_v46 = vor.u32 %v2123_v43, %v1872_v42 }
  0x44   :  { %356 = vmatpush.bf16.msra.mxu1 %v1809_v49 }
  0x46   :  { %338 = vmatmul.bf16.vlgmr.msra.gmra.mxu0 %v2625_v50 }
  0x47   :  { %357 = vmatmul.bf16.vlgmr.msra.gmra.mxu1 %v2625_v50  ;;  %370 = vmatpush.bf16.msra.mxu2 %v1873_v46 }
  0x4b   :  { %371 = vmatpush.bf16.msra.mxu2 %v1861_v52 }
  0x56   :  { %343 = vmatmul.bf16.gmra.mxu0 %v2635_v53 }
  0x57   :  { %362 = vmatmul.bf16.gmra.mxu1 %v2635_v53 }
  0xc3   :  { %v339_v55 = vpop.f32.mrf.mxu0 }
  0xc4   :  { %v358_v56 = vpop.f32.mrf.mxu1  ;;  %v340_v0 = vadd.f32 %v339_v55, %v196_v59  ;;  %v1848_v55 = vld [vmem:[#allocation2 + $0x50] sm:$0xf] }
  0xc5   :  { %v359_v58 = vadd.f32 %v358_v56, %v197_v57  ;;  %v2117_v56 = vld [vmem:[#allocation2 + $0x58] sm:$0xf0] }
  0xc6   :  { %v388_v5 = vpack.c.bf16 %v340_v0, %v340_v0 }
  0xc7   :  { %v392_v62 = vpack.c.bf16 %v359_v58, %v359_v58 }
  0xc8   :  { %v402_v11 = vunpack.c.l.b16 %v388_v5 }
  0xc9   :  { %v407_v3 = vunpack.c.l.b16 %v392_v62 }
  0xcb   :  { %v341_v60 = vpop.f32.mrf.mxu0 }
  0xcc   :  { %v360_v61 = vpop.f32.mrf.mxu1  ;;  %v342_v1 = vadd.f32 %v341_v60, %v196_v59  ;;  %v1836_v60 = vld [vmem:[#allocation2 + $0x38] sm:$0xf] }
  0xcd   :  { %v361_v63 = vadd.f32 %v360_v61, %v197_v57  ;;  %v2114_v61 = vld [vmem:[#allocation2 + $0x40] sm:$0xf0] }
  0xce   :  { %v389_v6 = vpack.c.bf16 %v342_v1, %v342_v1  ;;  %v1837_v0 = vor.u32 %v2114_v61, %v1836_v60  ;;  %v1824_v1 = vld [vmem:[#allocation2 + $0x20] sm:$0xf] }
  0xcf   :  { %v393_v2 = vpack.c.bf16 %v361_v63, %v361_v63 }
  0xd0   :  { %v403_v12 = vunpack.c.l.b16 %v389_v6  ;;  %v1812_v6 = vld [vmem:[#allocation2 + $0x8] sm:$0xf] }
  0xd1   :  { %v408_v4 = vunpack.c.l.b16 %v393_v2  ;;  %v2111_v2 = vld [vmem:[#allocation2 + $0x28] sm:$0xf0] }
  0xd2   :  { %v2647_v14 = vpack.c.b16 %v403_v12, %v402_v11  ;;  %v1825_v5 = vor.u32 %v2111_v2, %v1824_v1 }
  0xd3   :  { %v2643_v7 = vpack.c.b16 %v408_v4, %v407_v3  ;;  %v344_v8 = vpop.f32.mrf.mxu0 }
  0xd4   :  { %v363_v9 = vpop.f32.mrf.mxu1  ;;  %v345_v18 = vadd.f32 %v344_v8, %v196_v59  ;;  %v2108_v8 = vld [vmem:[#allocation2 + $0x10] sm:$0xf0] }
  0xd5   :  { %v415_v10 = vsel %vm410_vm0, %v2643_v7, 0  ;;  %v364_v13 = vadd.f32 %v363_v9, %v197_v57  ;;  %v1813_v11 = vor.u32 %v2108_v8, %v1812_v6 }
  0xd6   :  { %424 = vmatpush.bf16.xpose.msra.mxu3 %v415_v10  ;;  %v390_v23 = vpack.c.bf16 %v345_v18, %v345_v18 }
  0xd7   :  { %v394_v15 = vpack.c.bf16 %v364_v13, %v364_v13 }
  0xd8   :  { %v433_v27 = vunpack.c.l.b16 %v390_v23 }
  0xd9   :  { %v438_v21 = vunpack.c.l.b16 %v394_v15 }
  0xdb   :  { %v346_v16 = vpop.f32.mrf.mxu0 }
  0xdc   :  { %v365_v17 = vpop.f32.mrf.mxu1  ;;  %v347_v20 = vadd.f32 %v346_v16, %v196_v59  ;;  %v1849_v59 = vor.u32 %v2117_v56, %v1848_v55 }
  0xdd   :  { %v366_v19 = vadd.f32 %v365_v17, %v197_v57  ;;  %1898 = vmatmul.msk.bf16.vlgmr.msra.gmra.mxu3 %vm410_vm0, %v2647_v14 }
  0xde   :  { %v391_v25 = vpack.c.bf16 %v347_v20, %v347_v20  ;;  %372 = vmatpush.bf16.msra.mxu2 %v1849_v59 }
  0xdf   :  { %v395_v22 = vpack.c.bf16 %v366_v19, %v366_v19 }
  0xe0   :  { %v434_v28 = vunpack.c.l.b16 %v391_v25 }
  0xe1   :  { %v439_v24 = vunpack.c.l.b16 %v395_v22 }
  0xe2   :  { %v2655_v30 = vpack.c.b16 %v434_v28, %v433_v27  ;;  %373 = vmatpush.bf16.msra.mxu2 %v1837_v0 }
  0xe3   :  { %v2651_v26 = vpack.c.b16 %v439_v24, %v438_v21 }
  0xe5   :  { %v445_v29 = vsel %vm410_vm0, %v2651_v26, 0 }
  0xe6   :  { %454 = vmatpush.bf16.xpose.msrb.mxu3 %v445_v29  ;;  %374 = vmatpush.bf16.msra.mxu2 %v1825_v5 }
  0xea   :  { %375 = vmatpush.bf16.msra.mxu2 %v1813_v11 }
  0xed   :  { %1899 = vmatmul.msk.bf16.vlgmr.msrb.gmra.mxu3 %vm410_vm0, %v2655_v30  ;;  %376 = vmatmul.bf16.vlgmr.msra.gmra.mxu2 %v2625_v50 }
  0xfd   :  { %381 = vmatmul.bf16.gmra.mxu2 %v2635_v53 }
 0x160   :  { %v426_v32 = vpop.f32.mrf.mxu3 }
 0x161   :  { %v461_v33 = vmul.f32 0.17677669, %v426_v32 }
 0x163   :  { %v468_v37 = vadd.f32 %v2662_v31, %v461_v33 }
 0x165   :  { %v473_v40 = vsel %vm472_vm1, %v468_v37, -inf }
 0x166   :  { %474 = vmax.xlane.f32.xlu0 %v473_v40 }
 0x168   :  { %v428_v44 = vpop.f32.mrf.mxu3 }
 0x169   :  { %v462_v45 = vmul.f32 0.17677669, %v428_v44 }
 0x16b   :  { %v469_v49 = vadd.f32 %v2662_v31, %v462_v45 }
 0x16d   :  { %v476_v51 = vsel %vm472_vm1, %v469_v49, -inf }
 0x16e   :  { %477 = vmax.xlane.f32.xlu0 %v476_v51 }
 0x170   :  { %v456_v57 = vpop.f32.mrf.mxu3 }
 0x171   :  { %v463_v58 = vmul.f32 0.17677669, %v456_v57 }
 0x173   :  { %v470_v62 = vadd.f32 %v2662_v31, %v463_v58 }
 0x175   :  { %v479_v63 = vsel %vm472_vm1, %v470_v62, -inf }
 0x176   :  { %480 = vmax.xlane.f32.xlu1 %v479_v63 }
 0x178   :  { %v458_v3 = vpop.f32.mrf.mxu3 }
 0x179   :  { %v464_v4 = vmul.f32 0.17677669, %v458_v3 }
 0x17b   :  { %v471_v9 = vadd.f32 %v2662_v31, %v464_v4 }
 0x17d   :  { %v482_v10 = vsel %vm472_vm1, %v471_v9, -inf }
 0x17e   :  { %483 = vmax.xlane.f32.xlu1 %v482_v10 }
 0x182   :  { %577 = vrot.lane.b32.xlu0 %v2647_v14, %s2528_s9 }
 0x1d9   :  { %v475_v12 = vpop.xlane.xlu0 %474 }
 0x1da   :  { %v485_v13 = vsub.f32 %v468_v37, %v475_v12 }
 0x1dc   :  { %v489_v15 = vmul.f32 1.442695, %v485_v13 }
 0x1de   :  { %2226 = vpow2.f32 %v489_v15 }
 0x1e1   :  { %v478_v16 = vpop.xlane.xlu0 %477 }
 0x1e2   :  { %v486_v17 = vsub.f32 %v469_v49, %v478_v16 }
 0x1e4   :  { %v2227_v18 = vpop.eup %2226  ;;  %v491_v19 = vmul.f32 1.442695, %v486_v17 }
 0x1e5   :  { %v497_v20 = vsel %vm472_vm1, %v2227_v18, 0.0 }
 0x1e6   :  { %2228 = vpow2.f32 %v491_v19  ;;  %498 = vadd.xlane.f32.xlu2 %v497_v20 }
 0x1e9   :  { %v481_v21 = vpop.xlane.xlu1 %480 }
 0x1ea   :  { %v487_v22 = vsub.f32 %v470_v62, %v481_v21 }
 0x1ec   :  { %v2229_v23 = vpop.eup %2228  ;;  %v493_v24 = vmul.f32 1.442695, %v487_v22 }
 0x1ed   :  { %v500_v50 = vsel %vm472_vm1, %v2229_v23, 0.0 }
 0x1ee   :  { %2230 = vpow2.f32 %v493_v24  ;;  %501 = vadd.xlane.f32.xlu2 %v500_v50 }
 0x1f1   :  { %v484_v53 = vpop.xlane.xlu1 %483 }
 0x1f2   :  { %v488_v25 = vsub.f32 %v471_v9, %v484_v53 }
 0x1f4   :  { %v2678_v27 = vpop.eup %2230  ;;  %v495_v28 = vmul.f32 1.442695, %v488_v25  ;;  %v578_v49 = vpop.permute.xlu0 %577 }
 0x1f5   :  { %v503_v29 = vsel %vm472_vm1, %v2678_v27, 0.0 }
 0x1f6   :  { %2232 = vpow2.f32 %v495_v28  ;;  %504 = vadd.xlane.f32.xlu0 %v503_v29 }
 0x1fc   :  { %v2682_v32 = vpop.eup %2232 }
 0x1fd   :  { %v506_v33 = vsel %vm472_vm1, %v2682_v32, 0.0 }
 0x1fe   :  { %507 = vadd.xlane.f32.xlu1 %v506_v33 }
 0x206   :  { %579 = vrot.lane.b32.xlu2 %v2643_v7, %s2528_s9 }
 0x20a   :  { %601 = vrot.lane.b32.xlu0 %v2655_v30, %s2528_s9 }
 0x20e   :  { %733 = vrot.lane.b32.xlu2 %v2643_v7, %s2519_s11 }
 0x212   :  { %887 = vrot.lane.b32.xlu0 %v2643_v7, %s2529_s19  ;;  %v377_v7 = vpop.f32.mrf.mxu2 }
 0x213   :  { %v378_v36 = vadd.f32 %v377_v7, %v198_v34 }
 0x215   :  { %v396_v38 = vpack.c.bf16 %v378_v36, %v378_v36 }
 0x216   :  { %731 = vrot.lane.b32.xlu2 %v2647_v14, %s2519_s11 }
 0x217   :  { %603 = vrot.lane.b32.xlu1 %v2651_v26, %s2528_s9  ;;  %v528_v40 = vunpack.c.l.b16 %v396_v38 }
 0x21a   :  { %911 = vrot.lane.b32.xlu0 %v2651_v26, %s2529_s19  ;;  %v379_v35 = vpop.f32.mrf.mxu2 }
 0x21b   :  { %v380_v37 = vadd.f32 %v379_v35, %v198_v34 }
 0x21d   :  { %v397_v39 = vpack.c.bf16 %v380_v37, %v380_v37 }
 0x21e   :  { %755 = vrot.lane.b32.xlu2 %v2655_v30, %s2519_s11 }
 0x21f   :  { %757 = vrot.lane.b32.xlu1 %v2651_v26, %s2519_s11  ;;  %v529_v41 = vunpack.c.l.b16 %v397_v39 }
 0x221   :  { %v2709_v42 = vpack.c.b16 %v529_v41, %v528_v40 }
 0x222   :  { %v382_v43 = vpop.f32.mrf.mxu2 }
 0x223   :  { %542 = vmatpush.bf16.msra.mxu3 %v2709_v42  ;;  %v383_v26 = vadd.f32 %v382_v43, %v198_v34 }
 0x225   :  { %v398_v45 = vpack.c.bf16 %v383_v26, %v383_v26 }
 0x226   :  { %909 = vrot.lane.b32.xlu2 %v2655_v30, %s2529_s19 }
 0x227   :  { %885 = vrot.lane.b32.xlu1 %v2647_v14, %s2529_s19  ;;  %v556_v47 = vunpack.c.l.b16 %v398_v45 }
 0x22a   :  { %v384_v30 = vpop.f32.mrf.mxu2 }
 0x22b   :  { %v385_v44 = vadd.f32 %v384_v30, %v198_v34 }
 0x22d   :  { %v399_v14 = vpack.c.bf16 %v385_v44, %v385_v44 }
 0x22f   :  { %v557_v54 = vunpack.c.l.b16 %v399_v14 }
 0x231   :  { %v2712_v48 = vpack.c.b16 %v557_v54, %v556_v47 }
 0x233   :  { %570 = vmatpush.bf16.msrb.mxu3 %v2712_v48 }
 0x259   :  { %v499_v46 = vpop.xlane.xlu2 %498 }
 0x25a   :  { %2234 = vrcp.f32 %v499_v46 }
 0x260   :  { %v2235_v52 = vpop.eup %2234 }
 0x261   :  { %v502_v51 = vpop.xlane.xlu2 %501  ;;  %v513_v55 = vmul.f32 %v2235_v52, %v2227_v18 }
 0x262   :  { %2236 = vrcp.f32 %v502_v51 }
 0x263   :  { %v517_v57 = vpack.c.bf16 %v513_v55, %v513_v55 }
 0x265   :  { %v523_v63 = vunpack.c.l.b16 %v517_v57 }
 0x268   :  { %v2237_v56 = vpop.eup %2236 }
 0x269   :  { %v514_v58 = vmul.f32 %v2237_v56, %v2229_v23  ;;  %v580_v59 = vpop.permute.xlu2 %579  ;;  %v505_v60 = vpop.xlane.xlu0 %504 }
 0x26a   :  { %v585_v61 = vsel %vm410_vm0, %v580_v59, 0  ;;  %2238 = vrcp.f32 %v505_v60 }
 0x26b   :  { %v518_v62 = vpack.c.bf16 %v514_v58, %v514_v58  ;;  %594 = vmatpush.bf16.xpose.msrb.mxu2 %v585_v61 }
 0x26d   :  { %v524_v0 = vunpack.c.l.b16 %v518_v62 }
 0x26f   :  { %v525_v1 = vpack.c.b16 %v524_v0, %v523_v63 }
 0x270   :  { %v2239_v4 = vpop.eup %2238 }
 0x271   :  { %1900 = vmatmul.msk.bf16.vlgmr.msra.gmra.mxu3 %vm472_vm1, %v525_v1  ;;  %v734_v2 = vpop.permute.xlu2 %733  ;;  %v508_v3 = vpop.xlane.xlu1 %507  ;;  %v515_v6 = vmul.f32 %v2239_v4, %v2678_v27 }
 0x272   :  { %2240 = vrcp.f32 %v508_v3  ;;  %1902 = vmatmul.msk.bf16.vlgmr.msrb.gmra.mxu2 %vm410_vm0, %v578_v49  ;;  %v739_v5 = vsel %vm410_vm0, %v734_v2, 0 }
 0x273   :  { %748 = vmatpush.bf16.xpose.msrb.mxu0 %v739_v5  ;;  %v519_v9 = vpack.c.bf16 %v515_v6, %v515_v6 }
 0x275   :  { %v551_v15 = vunpack.c.l.b16 %v519_v9 }
 0x278   :  { %v2241_v8 = vpop.eup %2240 }
 0x279   :  { %v516_v10 = vmul.f32 %v2241_v8, %v2682_v32  ;;  %v732_v11 = vpop.permute.xlu2 %731 }
 0x27a   :  { %1906 = vmatmul.msk.bf16.vlgmr.msrb.gmra.mxu0 %vm410_vm0, %v732_v11 }
 0x27b   :  { %v520_v12 = vpack.c.bf16 %v516_v10, %v516_v10 }
 0x27c   :  { %v602_v13 = vpop.permute.xlu0 %601 }
 0x27d   :  { %v552_v16 = vunpack.c.l.b16 %v520_v12 }
 0x27f   :  { %v553_v17 = vpack.c.b16 %v552_v16, %v551_v15 }
 0x281   :  { %1901 = vmatmul.msk.bf16.vlgmr.msrb.gmra.mxu3 %vm472_vm1, %v553_v17  ;;  %v756_v53 = vpop.permute.xlu2 %755 }
 0x284   :  { %v888_v18 = vpop.permute.xlu0 %887 }
 0x285   :  { %v893_v19 = vsel %vm410_vm0, %v888_v18, 0 }
 0x286   :  { %902 = vmatpush.bf16.xpose.msra.mxu0 %v893_v19 }
 0x289   :  { %v604_v20 = vpop.permute.xlu1 %603  ;;  %v910_v27 = vpop.permute.xlu2 %909 }
 0x28a   :  { %v609_v21 = vsel %vm410_vm0, %v604_v20, 0 }
 0x28b   :  { %618 = vmatpush.bf16.xpose.msra.mxu3 %v609_v21 }
 0x28c   :  { %v912_v22 = vpop.permute.xlu0 %911 }
 0x28d   :  { %v917_v50 = vsel %vm410_vm0, %v912_v22, 0 }
 0x291   :  { %v758_v23 = vpop.permute.xlu1 %757 }
 0x292   :  { %1903 = vmatmul.msk.bf16.vlgmr.msra.gmra.mxu3 %vm410_vm0, %v602_v13  ;;  %v763_v24 = vsel %vm410_vm0, %v758_v23, 0 }
 0x293   :  { %772 = vmatpush.bf16.xpose.msrb.mxu1 %v763_v24 }
 0x299   :  { %v886_v25 = vpop.permute.xlu1 %885 }
 0x29a   :  { %1907 = vmatmul.msk.bf16.vlgmr.msrb.gmra.mxu1 %vm410_vm0, %v756_v53  ;;  %1910 = vmatmul.msk.bf16.vlgmr.msra.gmra.mxu0 %vm410_vm0, %v886_v25 }
 0x29b   :  { %926 = vmatpush.bf16.xpose.msra.mxu1 %v917_v50 }
 0x2aa   :  { %1911 = vmatmul.msk.bf16.vlgmr.msra.gmra.mxu1 %vm410_vm0, %v910_v27 }
 0x2f4   :  { %v2738_v30 = vpop.f32.mrf.mxu3 }
 0x2f5   :  { %v596_v28 = vpop.f32.mrf.mxu2 }
 0x2f6   :  { %v625_v29 = vmul.f32 0.17677669, %v596_v28 }
 0x2f7   :  { %v750_v32 = vpop.f32.mrf.mxu0 }
 0x2f8   :  { %v629_v33 = vadd.f32 %v2662_v31, %v625_v29  ;;  %v779_v39 = vmul.f32 0.17677669, %v750_v32 }
 0x2fa   :  { %v633_v7 = vsel %vm472_vm1, %v629_v33, -inf  ;;  %v783_v26 = vadd.f32 %v2662_v31, %v779_v39 }
 0x2fb   :  { %634 = vmax.xlane.f32.xlu1 %v633_v7 }
 0x2fc   :  { %v787_v44 = vsel %vm472_vm1, %v783_v26, -inf  ;;  %v2741_v45 = vpop.f32.mrf.mxu3 }
 0x2fd   :  { %v598_v34 = vpop.f32.mrf.mxu2 }
 0x2fe   :  { %v626_v35 = vmul.f32 0.17677669, %v598_v34 }
 0x2ff   :  { %v752_v36 = vpop.f32.mrf.mxu0 }
 0x300   :  { %v780_v37 = vmul.f32 0.17677669, %v752_v36  ;;  %v630_v38 = vadd.f32 %v2662_v31, %v626_v35 }
 0x302   :  { %v636_v40 = vsel %vm472_vm1, %v630_v38, -inf  ;;  %v784_v41 = vadd.f32 %v2662_v31, %v780_v37 }
 0x303   :  { %637 = vmax.xlane.f32.xlu0 %v636_v40 }
 0x304   :  { %v790_v43 = vsel %vm472_vm1, %v784_v41, -inf  ;;  %v2753_v56 = vpop.f32.mrf.mxu3 }
 0x305   :  { %791 = vmax.xlane.f32.xlu2 %v790_v43 }
 0x30b   :  { %788 = vmax.xlane.f32.xlu0 %v787_v44 }
 0x30c   :  { %v2762_v1 = vpop.f32.mrf.mxu3 }
 0x315   :  { %v620_v9 = vpop.f32.mrf.mxu3 }
 0x316   :  { %v627_v11 = vmul.f32 0.17677669, %v620_v9 }
 0x317   :  { %v774_v14 = vpop.f32.mrf.mxu1  ;;  %v904_v46 = vpop.f32.mrf.mxu0 }
 0x318   :  { %v781_v47 = vmul.f32 0.17677669, %v774_v14  ;;  %v933_v54 = vmul.f32 0.17677669, %v904_v46  ;;  %v631_v13 = vadd.f32 %v2662_v31, %v627_v11 }
 0x31a   :  { %v2744_v49 = vadd.f32 %v2662_v31, %v781_v47  ;;  %v2747_v51 = vadd.f32 %v2662_v31, %v933_v54  ;;  %v639_v15 = vsel %vm472_vm1, %v631_v13, -inf }
 0x31c   :  { %v793_v52 = vsel %vm472_vm1, %v2744_v49, -inf  ;;  %v941_v55 = vsel %vm472_vm1, %v2747_v51, -inf }
 0x31d   :  { %794 = vmax.xlane.f32.xlu1 %v793_v52  ;;  %942 = vmax.xlane.f32.xlu2 %v941_v55  ;;  %v622_v7 = vpop.f32.mrf.mxu3 }
 0x31e   :  { %v628_v35 = vmul.f32 0.17677669, %v622_v7 }
 0x31f   :  { %v776_v57 = vpop.f32.mrf.mxu1  ;;  %v906_v58 = vpop.f32.mrf.mxu0 }
 0x320   :  { %v782_v59 = vmul.f32 0.17677669, %v776_v57  ;;  %v934_v60 = vmul.f32 0.17677669, %v906_v58 }
 0x322   :  { %v2756_v61 = vadd.f32 %v2662_v31, %v782_v59  ;;  %v938_v62 = vadd.f32 %v2662_v31, %v934_v60 }
 0x324   :  { %v796_v63 = vsel %vm472_vm1, %v2756_v61, -inf  ;;  %v944_v0 = vsel %vm472_vm1, %v938_v62, -inf }
 0x325   :  { %797 = vmax.xlane.f32.xlu0 %v796_v63  ;;  %945 = vmax.xlane.f32.xlu1 %v944_v0 }
 0x327   :  { %v928_v2 = vpop.f32.mrf.mxu1 }
 0x328   :  { %v935_v3 = vmul.f32 0.17677669, %v928_v2 }
 0x32a   :  { %v2765_v4 = vadd.f32 %v2662_v31, %v935_v3 }
 0x32c   :  { %v947_v5 = vsel %vm472_vm1, %v2765_v4, -inf }
 0x32d   :  { %948 = vmax.xlane.f32.xlu0 %v947_v5 }
 0x32f   :  { %v930_v6 = vpop.f32.mrf.mxu1 }
 0x330   :  { %v936_v8 = vmul.f32 0.17677669, %v930_v6 }
 0x332   :  { %v2770_v10 = vadd.f32 %v2662_v31, %v936_v8 }
 0x334   :  { %v950_v12 = vsel %vm472_vm1, %v2770_v10, -inf }
 0x335   :  { %951 = vmax.xlane.f32.xlu2 %v950_v12 }
 0x33d   :  { %640 = vmax.xlane.f32.xlu2 %v639_v15 }
 0x355   :  { %686 = vrot.lane.b32.xlu2 %v2709_v42, %s2528_s9 }
 0x36e   :  { %v635_v16 = vpop.xlane.xlu1 %634 }
 0x36f   :  { %v645_v17 = vsub.f32 %v629_v33, %v635_v16 }
 0x371   :  { %v649_v18 = vmul.f32 1.442695, %v645_v17 }
 0x373   :  { %2242 = vpow2.f32 %v649_v18 }
 0x376   :  { %v638_v19 = vpop.xlane.xlu0 %637 }
 0x377   :  { %v646_v20 = vsub.f32 %v630_v38, %v638_v19  ;;  %v2795_v38 = vadd.f32 %v2662_v31, %v628_v35 }
 0x378   :  { %v792_v21 = vpop.xlane.xlu2 %791 }
 0x379   :  { %v2778_v22 = vpop.eup %2242  ;;  %v651_v23 = vmul.f32 1.442695, %v646_v20  ;;  %v800_v24 = vsub.f32 %v784_v41, %v792_v21  ;;  %v642_v41 = vsel %vm472_vm1, %v2795_v38, -inf }
 0x37a   :  { %v657_v50 = vsel %vm472_vm1, %v2778_v22, 0.0 }
 0x37b   :  { %2244 = vpow2.f32 %v651_v23  ;;  %658 = vadd.xlane.f32.xlu1 %v657_v50  ;;  %v805_v53 = vmul.f32 1.442695, %v800_v24 }
 0x37d   :  { %2246 = vpow2.f32 %v805_v53 }
 0x37e   :  { %v789_v25 = vpop.xlane.xlu0 %788 }
 0x37f   :  { %v799_v27 = vsub.f32 %v783_v26, %v789_v25 }
 0x381   :  { %v2782_v28 = vpop.eup %2244  ;;  %v803_v29 = vmul.f32 1.442695, %v799_v27 }
 0x382   :  { %v660_v32 = vsel %vm472_vm1, %v2782_v28, 0.0 }
 0x383   :  { %2248 = vpow2.f32 %v803_v29  ;;  %661 = vadd.xlane.f32.xlu0 %v660_v32  ;;  %v2786_v33 = vpop.eup %2246 }
 0x384   :  { %v814_v36 = vsel %vm472_vm1, %v2786_v33, 0.0 }
 0x389   :  { %v2788_v34 = vpop.eup %2248 }
 0x38a   :  { %v811_v37 = vsel %vm472_vm1, %v2788_v34, 0.0 }
 0x38b   :  { %815 = vadd.xlane.f32.xlu0 %v814_v36  ;;  %812 = vadd.xlane.f32.xlu1 %v811_v37 }
 0x390   :  { %v795_v39 = vpop.xlane.xlu1 %794  ;;  %v943_v31 = vpop.xlane.xlu2 %942 }
 0x391   :  { %v801_v40 = vsub.f32 %v2744_v49, %v795_v39  ;;  %v953_v5 = vsub.f32 %v2747_v51, %v943_v31 }
 0x393   :  { %v807_v43 = vmul.f32 1.442695, %v801_v40  ;;  %643 = vmax.xlane.f32.xlu1 %v642_v41  ;;  %v957_v9 = vmul.f32 1.442695, %v953_v5 }
 0x395   :  { %2250 = vpow2.f32 %v807_v43 }
 0x398   :  { %v946_v26 = vpop.xlane.xlu1 %945  ;;  %v798_v59 = vpop.xlane.xlu0 %797 }
 0x399   :  { %v954_v44 = vsub.f32 %v938_v62, %v946_v26  ;;  %v802_v60 = vsub.f32 %v2756_v61, %v798_v59 }
 0x39b   :  { %v959_v14 = vmul.f32 1.442695, %v954_v44  ;;  %v2800_v46 = vpop.eup %2250  ;;  %v809_v0 = vmul.f32 1.442695, %v802_v60 }
 0x39c   :  { %v817_v47 = vsel %vm472_vm1, %v2800_v46, 0.0 }
 0x39d   :  { %2252 = vpow2.f32 %v959_v14  ;;  %818 = vadd.xlane.f32.xlu2 %v817_v47 }
 0x39f   :  { %840 = vrot.lane.b32.xlu0 %v2709_v42, %s2519_s11 }
 0x3a0   :  { %v949_v6 = vpop.xlane.xlu0 %948 }
 0x3a1   :  { %v955_v11 = vsub.f32 %v2765_v4, %v949_v6 }
 0x3a3   :  { %v2806_v54 = vpop.eup %2252  ;;  %v961_v15 = vmul.f32 1.442695, %v955_v11 }
 0x3a4   :  { %v968_v49 = vsel %vm472_vm1, %v2806_v54, 0.0 }
 0x3a5   :  { %969 = vadd.xlane.f32.xlu2 %v968_v49 }
 0x3a8   :  { %v952_v52 = vpop.xlane.xlu2 %951 }
 0x3b0   :  { %v641_v55 = vpop.xlane.xlu2 %640 }
 0x3b1   :  { %v647_v57 = vsub.f32 %v631_v13, %v641_v55 }
 0x3b3   :  { %v653_v58 = vmul.f32 1.442695, %v647_v57 }
 0x3b5   :  { %2254 = vpow2.f32 %v653_v58 }
 0x3b6   :  { %2256 = vpow2.f32 %v809_v0 }
 0x3b8   :  { %v687_v62 = vpop.permute.xlu2 %686 }
 0x3b9   :  { %699 = vmatpush.bf16.msra.mxu2 %v687_v62 }
 0x3bb   :  { %v2811_v63 = vpop.eup %2254 }
 0x3bc   :  { %v663_v2 = vsel %vm472_vm1, %v2811_v63, 0.0  ;;  %v2817_v3 = vpop.eup %2256 }
 0x3bd   :  { %664 = vadd.xlane.f32.xlu1 %v663_v2  ;;  %865 = vrot.lane.b32.xlu2 %v2712_v48, %s2519_s11  ;;  %v820_v61 = vsel %vm472_vm1, %v2817_v3, 0.0 }
 0x3c5   :  { %1019 = vrot.lane.b32.xlu2 %v2712_v48, %s2529_s19 }
 0x3c9   :  { %821 = vadd.xlane.f32.xlu0 %v820_v61 }
 0x3d6   :  { %711 = vrot.lane.b32.xlu1 %v2712_v48, %s2528_s9  ;;  %v956_v48 = vsub.f32 %v2770_v10, %v952_v52 }
 0x3d8   :  { %v963_v24 = vmul.f32 1.442695, %v956_v48 }
 0x3ee   :  { %v659_v8 = vpop.xlane.xlu1 %658 }
 0x3ef   :  { %2258 = vrcp.f32 %v659_v8 }
 0x3f0   :  { %2260 = vpow2.f32 %v957_v9 }
 0x3f5   :  { %v2259_v13 = vpop.eup %2258 }
 0x3f6   :  { %v662_v12 = vpop.xlane.xlu0 %661  ;;  %v673_v16 = vmul.f32 %v2259_v13, %v2778_v22  ;;  %v2828_v17 = vpop.eup %2260 }
 0x3f7   :  { %2262 = vrcp.f32 %v662_v12  ;;  %v965_v4 = vsel %vm472_vm1, %v2828_v17, 0.0 }
 0x3f8   :  { %2264 = vpow2.f32 %v961_v15  ;;  %v677_v51 = vpack.c.bf16 %v673_v16, %v673_v16 }
 0x3fa   :  { %v683_v22 = vunpack.c.l.b16 %v677_v51 }
 0x3fd   :  { %v2263_v18 = vpop.eup %2262 }
 0x3fe   :  { %v674_v19 = vmul.f32 %v2263_v18, %v2782_v28  ;;  %v816_v20 = vpop.xlane.xlu0 %815  ;;  %v813_v21 = vpop.xlane.xlu1 %812 }
 0x3ff   :  { %2266 = vrcp.f32 %v816_v20  ;;  %v2834_v53 = vpop.eup %2264 }
 0x400   :  { %v678_v23 = vpack.c.bf16 %v674_v19, %v674_v19  ;;  %2268 = vrcp.f32 %v813_v21  ;;  %966 = vadd.xlane.f32.xlu1 %v965_v4  ;;  %v971_v32 = vsel %vm472_vm1, %v2834_v53, 0.0 }
 0x401   :  { %2270 = vpow2.f32 %v963_v24 }
 0x402   :  { %v684_v50 = vunpack.c.l.b16 %v678_v23 }
 0x404   :  { %v685_v25 = vpack.c.b16 %v684_v50, %v683_v22 }
 0x405   :  { %v2267_v27 = vpop.eup %2266 }
 0x406   :  { %v2269_v10 = vpop.eup %2268  ;;  %1904 = vmatmul.msk.bf16.vlgmr.msra.gmra.mxu2 %vm472_vm1, %v685_v25  ;;  %v644_v28 = vpop.xlane.xlu1 %643  ;;  %v828_v7 = vmul.f32 %v2267_v27, %v2786_v33 }
 0x407   :  { %v648_v29 = vsub.f32 %v2795_v38, %v644_v28  ;;  %v827_v35 = vmul.f32 %v2269_v10, %v2788_v34  ;;  %v2842_v37 = vpop.eup %2270 }
 0x408   :  { %972 = vadd.xlane.f32.xlu1 %v971_v32  ;;  %v832_v39 = vpack.c.bf16 %v828_v7, %v828_v7  ;;  %v974_v41 = vsel %vm472_vm1, %v2842_v37, 0.0 }
 0x409   :  { %v655_v36 = vmul.f32 1.442695, %v648_v29  ;;  %v831_v40 = vpack.c.bf16 %v827_v35, %v827_v35 }
 0x40a   :  { %v838_v43 = vunpack.c.l.b16 %v832_v39 }
 0x40b   :  { %2272 = vpow2.f32 %v655_v36  ;;  %v837_v26 = vunpack.c.l.b16 %v831_v40 }
 0x40d   :  { %v839_v34 = vpack.c.b16 %v838_v43, %v837_v26 }
 0x410   :  { %975 = vadd.xlane.f32.xlu1 %v974_v41  ;;  %v819_v14 = vpop.xlane.xlu2 %818 }
 0x411   :  { %v2273_v38 = vpop.eup %2272  ;;  %v841_v44 = vpop.permute.xlu0 %840 }
 0x412   :  { %853 = vmatpush.bf16.msrb.mxu2 %v841_v44  ;;  %v666_v33 = vsel %vm472_vm1, %v2273_v38, 0.0 }
 0x413   :  { %667 = vadd.xlane.f32.xlu0 %v666_v33 }
 0x416   :  { %1908 = vmatmul.msk.bf16.vlgmr.msrb.gmra.mxu2 %vm472_vm1, %v839_v34 }
 0x418   :  { %v970_v47 = vpop.xlane.xlu2 %969 }
 0x420   :  { %v866_v52 = vpop.permute.xlu2 %865 }
 0x427   :  { %994 = vrot.lane.b32.xlu0 %v2709_v42, %s2529_s19 }
 0x428   :  { %v1020_v19 = vpop.permute.xlu2 %1019 }
 0x430   :  { %v665_v31 = vpop.xlane.xlu1 %664 }
 0x431   :  { %2274 = vrcp.f32 %v665_v31 }
 0x437   :  { %v2275_v59 = vpop.eup %2274 }
 0x438   :  { %v675_v62 = vmul.f32 %v2275_v59, %v2811_v63  ;;  %v2132_v59 = vld [vmem:[#allocation6 + $0x10] sm:$0xff] }
 0x43a   :  { %v679_v61 = vpack.c.bf16 %v675_v62, %v675_v62  ;;  %v2131_v62 = vld [vmem:[#allocation6 + $0x8] sm:$0xff] }
 0x43c   :  { %v822_v55 = vpop.xlane.xlu0 %821  ;;  %v708_v12 = vunpack.c.l.b16 %v679_v61 }
 0x448   :  { %v712_v49 = vpop.permute.xlu1 %711 }
 0x449   :  { %724 = vmatpush.bf16.msrb.mxu3 %v712_v49 }
 0x44d   :  { %878 = vmatpush.bf16.msra.mxu3 %v866_v52  ;;  %v2134_v52 = vld [vmem:[#allocation6 + $0x20] sm:$0xff] }
 0x473   :  { %v967_v57 = vpop.xlane.xlu1 %966 }
 0x474   :  { %2276 = vrcp.f32 %v967_v57 }
 0x47a   :  { %v2277_v0 = vpop.eup %2276 }
 0x47b   :  { %v981_v6 = vmul.f32 %v2277_v0, %v2828_v17  ;;  %v973_v13 = vpop.xlane.xlu1 %972 }
 0x47d   :  { %v985_v18 = vpack.c.bf16 %v981_v6, %v981_v6 }
 0x47f   :  { %v991_v17 = vunpack.c.l.b16 %v985_v18 }
 0x483   :  { %v976_v25 = vpop.xlane.xlu1 %975 }
 0x486   :  { %v668_v58 = vpop.xlane.xlu0 %667 }
 0x487   :  { %2278 = vrcp.f32 %v668_v58  ;;  %v2133_v58 = vld [vmem:[#allocation6 + $0x18] sm:$0xff] }
 0x488   :  { %2280 = vrcp.f32 %v970_v47  ;;  %v2136_v47 = vld [vmem:[#allocation6 + $0x30] sm:$0xff] }
 0x489   :  { %v701_v60 = vpop.f32.mrf.mxu2  ;;  %2282 = vrcp.f32 %v822_v55 }
 0x48a   :  { %2284 = vrcp.f32 %v819_v14  ;;  %v2137_v14 = vld [vmem:[#allocation6 + $0x38] sm:$0xff] }
 0x48b   :  { %2286 = vrcp.f32 %v976_v25  ;;  %1168 = vmatpush.bf16.msrb.mxu0 %v2137_v14  ;;  %v2311_v14 = vld [vmem:[%s2980_s0 + $0x18] sm:$0xff] }
 0x48c   :  { %2288 = vrcp.f32 %v973_v13 }
 0x48d   :  { %v2279_v42 = vpop.eup %2278 }
 0x48e   :  { %v2281_v2 = vpop.eup %2280  ;;  %v676_v5 = vmul.f32 %v2279_v42, %v2273_v38 }
 0x48f   :  { %v982_v9 = vmul.f32 %v2281_v2, %v2806_v54  ;;  %v2283_v63 = vpop.eup %2282  ;;  %1169 = vmatpush.bf16.msrb.mxu0 %v2136_v47  ;;  %v2130_v2 = vld [vmem:[#allocation6] sm:$0xff] }
 0x490   :  { %v680_v8 = vpack.c.bf16 %v676_v5, %v676_v5  ;;  %v2285_v20 = vpop.eup %2284  ;;  %v830_v21 = vmul.f32 %v2283_v63, %v2817_v3 }
 0x491   :  { %v703_v11 = vpop.f32.mrf.mxu2  ;;  %v986_v51 = vpack.c.bf16 %v982_v9, %v982_v9  ;;  %v829_v24 = vmul.f32 %v2285_v20, %v2800_v46  ;;  %v2287_v3 = vpop.eup %2286 }
 0x492   :  { %v709_v15 = vunpack.c.l.b16 %v680_v8  ;;  %v2195_v16 = vpack.i.bf16 %v703_v11, %v701_v60  ;;  %v834_v50 = vpack.c.bf16 %v830_v21, %v830_v21  ;;  %v2289_v46 = vpop.eup %2288  ;;  %v984_v35 = vmul.f32 %v2287_v3, %v2842_v37 }
 0x493   :  { %v992_v54 = vunpack.c.l.b16 %v986_v51  ;;  %v833_v27 = vpack.c.bf16 %v829_v24, %v829_v24  ;;  %v983_v36 = vmul.f32 %v2289_v46, %v2834_v53  ;;  %v2135_v53 = vld [vmem:[#allocation6 + $0x28] sm:$0xff]  ;;  %v2308_v46 = vld [vmem:[%s2980_s0] sm:$0xff] }
 0x494   :  { %v710_v48 = vpack.c.b16 %v709_v15, %v708_v12  ;;  %2196 = vrot.lane.b32.xlu1 %v2195_v16, %s2529_s19  ;;  %v863_v10 = vunpack.c.l.b16 %v834_v50  ;;  %v988_v39 = vpack.c.bf16 %v984_v35, %v984_v35  ;;  %1170 = vmatpush.bf16.msrb.mxu0 %v2135_v53 }
 0x495   :  { %v993_v22 = vpack.c.b16 %v992_v54, %v991_v17  ;;  %v862_v29 = vunpack.c.l.b16 %v833_v27  ;;  %v987_v40 = vpack.c.bf16 %v983_v36, %v983_v36 }
 0x496   :  { %1905 = vmatmul.msk.bf16.vlgmr.msrb.gmra.mxu3 %vm472_vm1, %v710_v48  ;;  %v1017_v41 = vunpack.c.l.b16 %v988_v39 }
 0x497   :  { %1032 = vmatpush.bf16.msrb.mxu3 %v1020_v19  ;;  %v864_v7 = vpack.c.b16 %v863_v10, %v862_v29  ;;  %v1016_v43 = vunpack.c.l.b16 %v987_v40  ;;  %v2309_v40 = vld [vmem:[%s2980_s0 + $0x8] sm:$0xff] }
 0x498   :  { %1171 = vmatpush.bf16.msrb.mxu0 %v2134_v52 }
 0x499   :  { %v855_v4 = vpop.f32.mrf.mxu2  ;;  %v995_v23 = vpop.permute.xlu0 %994  ;;  %v1018_v26 = vpack.c.b16 %v1017_v41, %v1016_v43 }
 0x49a   :  { %1007 = vmatpush.bf16.msra.mxu2 %v995_v23 }
 0x49c   :  { %1172 = vmatpush.bf16.msrb.mxu0 %v2133_v58 }
 0x49d   :  { %1912 = vmatmul.msk.bf16.vlgmr.msra.gmra.mxu2 %vm472_vm1, %v993_v22 }
 0x4a0   :  { %1173 = vmatpush.bf16.msrb.mxu0 %v2132_v59 }
 0x4a1   :  { %v857_v28 = vpop.f32.mrf.mxu2 }
 0x4a2   :  { %v2200_v32 = vpack.i.bf16 %v857_v28, %v855_v4 }
 0x4a4   :  { %2201 = vrot.lane.b32.xlu0 %v2200_v32, %s2519_s11  ;;  %1174 = vmatpush.bf16.msrb.mxu0 %v2131_v62 }
 0x4a6   :  { %1909 = vmatmul.msk.bf16.vlgmr.msra.gmra.mxu3 %vm472_vm1, %v864_v7  ;;  %v2883_v7 = vld [vmem:[#allocation13] sm:$0x7f] }
 0x4a8   :  { %1175 = vmatpush.bf16.msrb.mxu0 %v2130_v2 }
 0x4b6   :  { %1913 = vmatmul.msk.bf16.vlgmr.msrb.gmra.mxu3 %vm472_vm1, %v1018_v26 }
 0x506   :  { %v2197_v61 = vpop.permute.xlu1 %2196 }
 0x507   :  { %v2199_v6 = vunpack.i.h.bf16 %v2197_v61  ;;  %v2198_v8 = vunpack.i.l.bf16 %v2197_v61 }
 0x509   :  { %v1088_v13 = vsel %vm410_vm0, %v2741_v45, %v2199_v6  ;;  %v1087_v15 = vsel %vm410_vm0, %v2738_v30, %v2198_v8 }
 0x516   :  { %v2202_v5 = vpop.permute.xlu0 %2201 }
 0x517   :  { %v2204_v9 = vunpack.i.h.bf16 %v2202_v5  ;;  %v2203_v11 = vunpack.i.l.bf16 %v2202_v5 }
 0x519   :  { %v726_v38 = vpop.f32.mrf.mxu3  ;;  %v1092_v48 = vsel %vm1091_vm2, %v1087_v15, %v2203_v11  ;;  %v1093_v63 = vsel %vm1091_vm2, %v1088_v13, %v2204_v9 }
 0x520   :  { %v1009_v44 = vpop.f32.mrf.mxu2 }
 0x521   :  { %v728_v33 = vpop.f32.mrf.mxu3 }
 0x522   :  { %v2210_v34 = vpack.i.bf16 %v728_v33, %v726_v38  ;;  %v2310_v38 = vld [vmem:[%s2980_s0 + $0x10] sm:$0xff] }
 0x524   :  { %2211 = vrot.lane.b32.xlu0 %v2210_v34, %s2529_s19 }
 0x528   :  { %v1011_v31 = vpop.f32.mrf.mxu2 }
 0x529   :  { %v2205_v37 = vpack.i.bf16 %v1011_v31, %v1009_v44  ;;  %v880_v49 = vpop.f32.mrf.mxu3  ;;  %v2530_v31 = vmov 128.0  }
 0x52a   :  { %2290 = vrcp.f32 %v2530_v31  ;;  %v1958_v31 = vld [vmem:[#allocation7 + $0x18] sm:$0xf0] }
 0x52b   :  { %2206 = vrot.lane.b32.xlu2 %v2205_v37, %s2528_s9 }
 0x530   :  { %v2291_v37 = vpop.eup %2290 }
 0x531   :  { %v882_v55 = vpop.f32.mrf.mxu3  ;;  %vm1204_vm4 = vweird.f32 %v2291_v37 }
 0x532   :  { %v2215_v57 = vpack.i.bf16 %v882_v55, %v880_v49  ;;  %v1200_v49 = vmul.f32 128.0, %v2291_v37 }
 0x534   :  { %2216 = vrot.lane.b32.xlu2 %v2215_v57, %s2519_s11  ;;  %v1201_v53 = vsub.f32 1.0, %v1200_v49  ;;  %v2139_v49 = vld [vmem:[#allocation7 + $0x4] sm:$0xf0] }
 0x536   :  { %v1202_v52 = vmul.f32 %v2291_v37, %v1201_v53 }
 0x538   :  { %v1203_v55 = vadd.f32 %v2291_v37, %v1202_v52 }
 0x539   :  { %v1034_v60 = vpop.f32.mrf.mxu3 }
 0x53a   :  { %v2898_v57 = vsel %vm1204_vm4, %v2291_v37, %v1203_v55  ;;  %v1948_v37 = vld [vmem:[#allocation7] sm:$0xf]  ;;  %v2138_v55 = vld [vmem:[#allocation7 + $0x4] sm:$0xf] }
 0x541   :  { %v1036_v0 = vpop.f32.mrf.mxu3 }
 0x542   :  { %v2220_v42 = vpack.i.bf16 %v1036_v0, %v1034_v60 }
 0x544   :  { %2221 = vrot.lane.b32.xlu0 %v2220_v42, %s2528_s9 }
 0x585   :  { %v2207_v12 = vpop.permute.xlu2 %2206 }
 0x586   :  { %v2209_v16 = vunpack.i.h.bf16 %v2207_v12  ;;  %v2208_v18 = vunpack.i.l.bf16 %v2207_v12 }
 0x588   :  { %v1097_v51 = vsel %vm1096_vm3, %v1092_v48, %v2208_v18  ;;  %v1098_v19 = vsel %vm1096_vm3, %v1093_v63, %v2209_v16  ;;  %v2004_v16 = vld [vmem:[#allocation7 + $0x70] sm:$0xf]  ;;  %v2153_v18 = vld [vmem:[#allocation7 + $0x74] sm:$0xf0]  ;;  %v2152_v48 = vld [vmem:[#allocation7 + $0x74] sm:$0xf] }
 0x589   :  { %v1101_v20 = vpack.c.bf16 %v1098_v19, %v1097_v51  ;;  %v2005_v63 = vor.u32 %v2153_v18, %v2004_v16  ;;  %v2006_v51 = vld [vmem:[#allocation7 + $0x78] sm:$0xf0] }
 0x58a   :  { %v2009_v19 = vor.u32 %v2152_v48, %v2006_v51 }
 0x58b   :  { %1176 = vmatmul.bf16.vlgmr.msrb.gmra.mxu0 %v1101_v20  ;;  %1392 = vmatpush.bf16.msrb.mxu1 %v2005_v63  ;;  %v1996_v20 = vld [vmem:[#allocation7 + $0x60] sm:$0xf] }
 0x58c   :  { %1411 = vmatpush.bf16.msrb.mxu2 %v2009_v19 }
 0x58e   :  { %v2217_v4 = vpop.permute.xlu2 %2216 }
 0x58f   :  { %v2219_v23 = vunpack.i.h.bf16 %v2217_v4  ;;  %v2218_v24 = vunpack.i.l.bf16 %v2217_v4  ;;  %v1998_v4 = vld [vmem:[#allocation7 + $0x68] sm:$0xf0] }
 0x596   :  { %v2212_v17 = vpop.permute.xlu0 %2211 }
 0x597   :  { %v2214_v21 = vunpack.i.h.bf16 %v2212_v17  ;;  %v2213_v54 = vunpack.i.l.bf16 %v2212_v17  ;;  %v2151_v17 = vld [vmem:[#allocation7 + $0x64] sm:$0xf0] }
 0x599   :  { %v1090_v45 = vsel %vm410_vm0, %v2762_v1, %v2214_v21  ;;  %v1089_v30 = vsel %vm410_vm0, %v2753_v56, %v2213_v54  ;;  %v1119_v1 = vperm.slane %v2883_v7, 0  ;;  %v2150_v21 = vld [vmem:[#allocation7 + $0x64] sm:$0xf]  ;;  %v1997_v54 = vor.u32 %v2151_v17, %v1996_v20 }
 0x59a   :  { %v1094_v27 = vsel %vm1091_vm2, %v1089_v30, %v2218_v24  ;;  %v1095_v10 = vsel %vm1091_vm2, %v1090_v45, %v2219_v23  ;;  %v2001_v45 = vor.u32 %v2150_v21, %v1998_v4  ;;  %v1988_v30 = vld [vmem:[#allocation7 + $0x50] sm:$0xf]  ;;  %v2149_v23 = vld [vmem:[#allocation7 + $0x54] sm:$0xf0]  ;;  %v2148_v24 = vld [vmem:[#allocation7 + $0x54] sm:$0xf] }
 0x59b   :  { %1393 = vmatpush.bf16.msrb.mxu1 %v1997_v54  ;;  %v1278_v54 = vperm.slane %v2883_v7, 1 }
 0x59c   :  { %1412 = vmatpush.bf16.msrb.mxu2 %v2001_v45 }
 0x5b6   :  { %v2222_v22 = vpop.permute.xlu0 %2221 }
 0x5b7   :  { %v2224_v50 = vunpack.i.h.bf16 %v2222_v22  ;;  %v2223_v25 = vunpack.i.l.bf16 %v2222_v22  ;;  %v1989_v22 = vor.u32 %v2149_v23, %v1988_v30 }
 0x5b9   :  { %v1099_v28 = vsel %vm1096_vm3, %v1094_v27, %v2223_v25  ;;  %v1100_v29 = vsel %vm1096_vm3, %v1095_v10, %v2224_v50  ;;  %v1990_v50 = vld [vmem:[#allocation7 + $0x58] sm:$0xf0]  ;;  %1394 = vmatpush.bf16.msrb.mxu1 %v1989_v22  ;;  %v1980_v27 = vld [vmem:[#allocation7 + $0x40] sm:$0xf]  ;;  %v2147_v10 = vld [vmem:[#allocation7 + $0x44] sm:$0xf0] }
 0x5ba   :  { %v1102_v32 = vpack.c.bf16 %v1100_v29, %v1099_v28  ;;  %v1993_v25 = vor.u32 %v2148_v24, %v1990_v50  ;;  %v2146_v28 = vld [vmem:[#allocation7 + $0x44] sm:$0xf]  ;;  %v1981_v29 = vor.u32 %v2147_v10, %v1980_v27  ;;  %v1283_v24 = vperm.slane %v2883_v7, 2 }
 0x5bc   :  { %1181 = vmatmul.bf16.gmra.mxu0 %v1102_v32  ;;  %1413 = vmatpush.bf16.msrb.mxu2 %v1993_v25  ;;  %v1982_v32 = vld [vmem:[#allocation7 + $0x48] sm:$0xf0] }
 0x5bd   :  { %1395 = vmatpush.bf16.msrb.mxu1 %v1981_v29  ;;  %v2161_v29 = vld [vmem:[#allocation10 + $0x38] sm:$0xff] }
 0x5be   :  { %1571 = vmatpush.bf16.msra.mxu3 %v2161_v29 }
 0x608   :  { %v1177_v56 = vpop.f32.mrf.mxu0 }
 0x609   :  { %v1178_v3 = vadd.f32 %v1177_v56, %v1119_v1  ;;  %v1972_v56 = vld [vmem:[#allocation7 + $0x30] sm:$0xf] }
 0x60b   :  { %v1187_v35 = vadd.f32 %v2308_v46, %v1178_v3  ;;  %v2145_v3 = vld [vmem:[#allocation7 + $0x34] sm:$0xf0]  ;;  %v2144_v46 = vld [vmem:[#allocation7 + $0x34] sm:$0xf] }
 0x60d   :  { %1191 = vadd.xlane.f32.xlu2 %v1187_v35 }
 0x610   :  { %v1179_v36 = vpop.f32.mrf.mxu0 }
 0x611   :  { %v1180_v39 = vadd.f32 %v1179_v36, %v1119_v1  ;;  %v1974_v36 = vld [vmem:[#allocation7 + $0x38] sm:$0xf0] }
 0x613   :  { %v1188_v41 = vadd.f32 %v2309_v40, %v1180_v39  ;;  %v1977_v39 = vor.u32 %v2144_v46, %v1974_v36  ;;  %v1964_v40 = vld [vmem:[#allocation7 + $0x20] sm:$0xf] }
 0x615   :  { %1193 = vadd.xlane.f32.xlu1 %v1188_v41 }
 0x639   :  { %v1182_v43 = vpop.f32.mrf.mxu0 }
 0x63a   :  { %v1183_v26 = vadd.f32 %v1182_v43, %v1119_v1  ;;  %v2142_v43 = vld [vmem:[#allocation7 + $0x24] sm:$0xf] }
 0x63c   :  { %v1189_v44 = vadd.f32 %v2310_v38, %v1183_v26  ;;  %v1966_v38 = vld [vmem:[#allocation7 + $0x28] sm:$0xf0] }
 0x63e   :  { %1195 = vadd.xlane.f32.xlu0 %v1189_v44 }
 0x641   :  { %v1184_v33 = vpop.f32.mrf.mxu0 }
 0x642   :  { %v1185_v34 = vadd.f32 %v1184_v33, %v1119_v1  ;;  %v1985_v1 = vor.u32 %v2146_v28, %v1982_v32  ;;  %v1956_v33 = vld [vmem:[#allocation7 + $0x10] sm:$0xf] }
 0x644   :  { %v1190_v47 = vadd.f32 %v2311_v14, %v1185_v34  ;;  %1414 = vmatpush.bf16.msrb.mxu2 %v1985_v1  ;;  %v2141_v34 = vld [vmem:[#allocation7 + $0x14] sm:$0xf0]  ;;  %v2140_v14 = vld [vmem:[#allocation7 + $0x14] sm:$0xf] }
 0x645   :  { %v1961_v52 = vor.u32 %v2140_v14, %v1958_v31 }
 0x646   :  { %1197 = vadd.xlane.f32.xlu2 %v1190_v47 }
 0x648   :  { %1415 = vmatpush.bf16.msrb.mxu2 %v1977_v39  ;;  %v2159_v39 = vld [vmem:[#allocation10 + $0x28] sm:$0xff] }
 0x680   :  { %v1192_v58 = vpop.xlane.xlu2 %1191 }
 0x681   :  { %v1206_v59 = vmul.f32 %v2898_v57, %v1192_v58  ;;  %v1950_v58 = vld [vmem:[#allocation7 + $0x8] sm:$0xf0] }
 0x683   :  { %v2901_v60 = vsub.f32 %v1187_v35, %v1206_v59  ;;  %v1973_v35 = vor.u32 %v2145_v3, %v1972_v56  ;;  %v2160_v56 = vld [vmem:[#allocation10 + $0x30] sm:$0xff] }
 0x684   :  { %v2168_v3 = vld [vmem:[#allocation10 + $0x70] sm:$0xff]  ;;  %1572 = vmatpush.bf16.msra.mxu3 %v2160_v56 }
 0x685   :  { %v1214_v62 = vmul.f32 %v2901_v60, %v2901_v60  ;;  %1396 = vmatpush.bf16.msrb.mxu1 %v1973_v35 }
 0x687   :  { %1218 = vadd.xlane.f32.xlu1 %v1214_v62  ;;  %v1949_v62 = vor.u32 %v2139_v49, %v1948_v37 }
 0x688   :  { %v1194_v0 = vpop.xlane.xlu1 %1193  ;;  %1573 = vmatpush.bf16.msra.mxu3 %v2159_v39 }
 0x689   :  { %v1207_v42 = vmul.f32 %v2898_v57, %v1194_v0  ;;  %v1953_v0 = vor.u32 %v2138_v55, %v1950_v58 }
 0x68b   :  { %v2906_v2 = vsub.f32 %v1188_v41, %v1207_v42  ;;  %v2143_v41 = vld [vmem:[#allocation7 + $0x24] sm:$0xf0] }
 0x68c   :  { %v1965_v26 = vor.u32 %v2143_v41, %v1964_v40  ;;  %v2167_v40 = vld [vmem:[#allocation10 + $0x68] sm:$0xff] }
 0x68d   :  { %v1215_v61 = vmul.f32 %v2906_v2, %v2906_v2 }
 0x68e   :  { %1397 = vmatpush.bf16.msrb.mxu1 %v1965_v26  ;;  %v2158_v26 = vld [vmem:[#allocation10 + $0x20] sm:$0xff] }
 0x68f   :  { %1220 = vadd.xlane.f32.xlu0 %v1215_v61  ;;  %1574 = vmatpush.bf16.msra.mxu3 %v2158_v26 }
 0x6b1   :  { %v1196_v5 = vpop.xlane.xlu0 %1195 }
 0x6b2   :  { %v1208_v6 = vmul.f32 %v2898_v57, %v1196_v5 }
 0x6b4   :  { %v2911_v8 = vsub.f32 %v1189_v44, %v1208_v6  ;;  %v1969_v44 = vor.u32 %v2142_v43, %v1966_v38 }
 0x6b6   :  { %v1216_v9 = vmul.f32 %v2911_v8, %v2911_v8  ;;  %1416 = vmatpush.bf16.msrb.mxu2 %v1969_v44 }
 0x6b8   :  { %1222 = vadd.xlane.f32.xlu2 %v1216_v9 }
 0x6b9   :  { %v1198_v11 = vpop.xlane.xlu2 %1197 }
 0x6ba   :  { %v1209_v12 = vmul.f32 %v2898_v57, %v1198_v11  ;;  %1417 = vmatpush.bf16.msrb.mxu2 %v1961_v52 }
 0x6bc   :  { %v2916_v13 = vsub.f32 %v1190_v47, %v1209_v12  ;;  %v1957_v47 = vor.u32 %v2141_v34, %v1956_v33 }
 0x6be   :  { %v1217_v15 = vmul.f32 %v2916_v13, %v2916_v13  ;;  %1398 = vmatpush.bf16.msrb.mxu1 %v1957_v47  ;;  %1418 = vmatpush.bf16.msrb.mxu2 %v1953_v0 }
 0x6c0   :  { %1224 = vadd.xlane.f32.xlu1 %v1217_v15 }
 0x6c2   :  { %1399 = vmatpush.bf16.msrb.mxu1 %v1949_v62 }
 0x6fa   :  { %v1219_v53 = vpop.xlane.xlu1 %1218 }
 0x6fb   :  { %v1226_v59 = vmul.f32 %v1219_v53, %v2898_v57 }
 0x6fd   :  { %v1230_v42 = vadd.f32 1e-05, %v1226_v59 }
 0x6ff   :  { %2292 = vrsqrt.f32 %v1230_v42  ;;  %vm1240_vm6 = vweird.f32 %v1230_v42 }
 0x702   :  { %v1221_v61 = vpop.xlane.xlu0 %1220 }
 0x703   :  { %v1227_v5 = vmul.f32 %v1221_v61, %v2898_v57  ;;  %v2157_v61 = vld [vmem:[#allocation10 + $0x18] sm:$0xff] }
 0x704   :  { %1575 = vmatpush.bf16.msra.mxu3 %v2157_v61 }
 0x705   :  { %v2293_v6 = vpop.eup %2292  ;;  %v1231_v9 = vadd.f32 1e-05, %v1227_v5  ;;  %v2156_v5 = vld [vmem:[#allocation10 + $0x10] sm:$0xff] }
 0x706   :  { %v1235_v11 = vmul.f32 %v2293_v6, %v1230_v42  ;;  %vm1241_vm5 = vweird.f32 %v2293_v6 }
 0x707   :  { %2294 = vrsqrt.f32 %v1231_v9  ;;  %vm1242_vm7 = vmor %vm1240_vm6, %vm1241_vm5  ;;  %vm1250_vm9 = vweird.f32 %v1231_v9 }
 0x708   :  { %v1236_v12 = vmul.f32 %v2293_v6, %v1235_v11  ;;  %1576 = vmatpush.bf16.msra.mxu3 %v2156_v5  ;;  %v2154_v11 = vld [vmem:[#allocation10] sm:$0xff] }
 0x70a   :  { %v1237_v15 = vmul.f32 0.5, %v1236_v12  ;;  %v2163_v12 = vld [vmem:[#allocation10 + $0x48] sm:$0xff] }
 0x70c   :  { %v1238_v16 = vsub.f32 1.5, %v1237_v15  ;;  %v2162_v15 = vld [vmem:[#allocation10 + $0x40] sm:$0xff] }
 0x70d   :  { %v2295_v18 = vpop.eup %2294 }
 0x70e   :  { %v1239_v48 = vmul.f32 %v2293_v6, %v1238_v16  ;;  %v1245_v63 = vmul.f32 %v2295_v18, %v1231_v9  ;;  %vm1251_vm8 = vweird.f32 %v2295_v18  ;;  %v2164_v9 = vld [vmem:[#allocation10 + $0x50] sm:$0xff]  ;;  %v1306_v16 = vld [vmem:[#allocation9] sm:$0x3] }
 0x70f   :  { %vm1252_vm10 = vmor %vm1250_vm9, %vm1251_vm8 }
 0x710   :  { %v1246_v51 = vmul.f32 %v2295_v18, %v1245_v63  ;;  %v1243_v19 = vsel %vm1242_vm7, %v2293_v6, %v1239_v48  ;;  %v2165_v6 = vld [vmem:[#allocation10 + $0x58] sm:$0xff]  ;;  %v1308_v48 = vperm.slane %v1306_v16, 0 }
 0x711   :  { %v1274_v21 = vmul.f32 %v1243_v19, %v2901_v60 }
 0x712   :  { %v1247_v20 = vmul.f32 0.5, %v1246_v51 }
 0x713   :  { %v1279_v23 = vmul.f32 %v1278_v54, %v1274_v21 }
 0x714   :  { %v1248_v17 = vsub.f32 1.5, %v1247_v20  ;;  %v1309_v20 = vperm.slane %v1306_v16, 1 }
 0x715   :  { %v2926_v50 = vadd.f32 %v1283_v24, %v1279_v23 }
 0x716   :  { %v1249_v4 = vmul.f32 %v2295_v18, %v1248_v17 }
 0x718   :  { %v1253_v45 = vsel %vm1252_vm10, %v2295_v18, %v1249_v4 }
 0x719   :  { %v1275_v30 = vmul.f32 %v1253_v45, %v2906_v2  ;;  %v2169_v2 = vld [vmem:[#allocation10 + $0x78] sm:$0xff] }
 0x71a   :  { %1590 = vmatpush.bf16.msra.mxu0 %v2169_v2 }
 0x71b   :  { %v1280_v22 = vmul.f32 %v1278_v54, %v1275_v30 }
 0x71d   :  { %v2928_v25 = vadd.f32 %v1283_v24, %v1280_v22 }
 0x71e   :  { %1591 = vmatpush.bf16.msra.mxu0 %v2168_v3 }
 0x71f   :  { %v1288_v27 = vpack.c.bf16 %v2928_v25, %v2926_v50 }
 0x721   :  { %1400 = vmatmul.bf16.vlgmr.msrb.gmra.mxu1 %v1288_v27  ;;  %1419 = vmatmul.bf16.vlgmr.msrb.gmra.mxu2 %v1288_v27 }
 0x722   :  { %1592 = vmatpush.bf16.msra.mxu0 %v2167_v40 }
 0x72b   :  { %v1223_v60 = vpop.xlane.xlu2 %1222 }
 0x72c   :  { %v1228_v10 = vmul.f32 %v1223_v60, %v2898_v57 }
 0x72e   :  { %v1232_v28 = vadd.f32 1e-05, %v1228_v10 }
 0x730   :  { %2296 = vrsqrt.f32 %v1232_v28  ;;  %vm1260_vm12 = vweird.f32 %v1232_v28 }
 0x733   :  { %v1225_v32 = vpop.xlane.xlu1 %1224 }
 0x734   :  { %v1229_v1 = vmul.f32 %v1225_v32, %v2898_v57 }
 0x736   :  { %v2297_v46 = vpop.eup %2296  ;;  %v1233_v35 = vadd.f32 1e-05, %v1229_v1 }
 0x737   :  { %v1255_v36 = vmul.f32 %v2297_v46, %v1232_v28  ;;  %vm1261_vm11 = vweird.f32 %v2297_v46 }
 0x738   :  { %2298 = vrsqrt.f32 %v1233_v35  ;;  %vm1262_vm13 = vmor %vm1260_vm12, %vm1261_vm11  ;;  %vm1270_vm15 = vweird.f32 %v1233_v35 }
 0x739   :  { %v1256_v41 = vmul.f32 %v2297_v46, %v1255_v36 }
 0x73b   :  { %v1257_v43 = vmul.f32 0.5, %v1256_v41  ;;  %v1474_v41 = vperm.slane %v2883_v7, 3 }
 0x73d   :  { %v1258_v38 = vsub.f32 1.5, %v1257_v43 }
 0x73e   :  { %v2299_v44 = vpop.eup %2298 }
 0x73f   :  { %v1259_v33 = vmul.f32 %v2297_v46, %v1258_v38  ;;  %v1265_v34 = vmul.f32 %v2299_v44, %v1233_v35  ;;  %vm1271_vm14 = vweird.f32 %v2299_v44 }
 0x740   :  { %vm1272_vm0 = vmor %vm1270_vm15, %vm1271_vm14 }
 0x741   :  { %v1266_v14 = vmul.f32 %v2299_v44, %v1265_v34  ;;  %v1263_v31 = vsel %vm1262_vm13, %v2297_v46, %v1259_v33 }
 0x742   :  { %v1276_v49 = vmul.f32 %v1263_v31, %v2911_v8  ;;  %v2166_v8 = vld [vmem:[#allocation10 + $0x60] sm:$0xff] }
 0x743   :  { %v1267_v47 = vmul.f32 0.5, %v1266_v14  ;;  %1593 = vmatpush.bf16.msra.mxu0 %v2166_v8 }
 0x744   :  { %v1281_v58 = vmul.f32 %v1278_v54, %v1276_v49 }
 0x745   :  { %v1268_v37 = vsub.f32 1.5, %v1267_v47 }
 0x746   :  { %v2936_v62 = vadd.f32 %v1283_v24, %v1281_v58 }
 0x747   :  { %v1269_v53 = vmul.f32 %v2299_v44, %v1268_v37  ;;  %1594 = vmatpush.bf16.msra.mxu0 %v2165_v6 }
 0x749   :  { %v1273_v52 = vsel %vm1272_vm0, %v2299_v44, %v1269_v53 }
 0x74a   :  { %v1277_v55 = vmul.f32 %v1273_v52, %v2916_v13  ;;  %v2155_v13 = vld [vmem:[#allocation10 + $0x8] sm:$0xff] }
 0x74b   :  { %1577 = vmatpush.bf16.msra.mxu3 %v2155_v13  ;;  %1595 = vmatpush.bf16.msra.mxu0 %v2164_v9 }
 0x74c   :  { %v1282_v59 = vmul.f32 %v1278_v54, %v1277_v55 }
 0x74e   :  { %v2938_v0 = vadd.f32 %v1283_v24, %v1282_v59 }
 0x74f   :  { %1578 = vmatpush.bf16.msra.mxu3 %v2154_v11  ;;  %1596 = vmatpush.bf16.msra.mxu0 %v2163_v12 }
 0x750   :  { %v1289_v42 = vpack.c.bf16 %v2938_v0, %v2936_v62 }
 0x752   :  { %1405 = vmatmul.bf16.gmra.mxu1 %v1289_v42  ;;  %1424 = vmatmul.bf16.gmra.mxu2 %v1289_v42 }
 0x753   :  { %1597 = vmatpush.bf16.msra.mxu0 %v2162_v15 }
 0x79e   :  { %v1401_v18 = vpop.f32.mrf.mxu1 }
 0x79f   :  { %v1402_v51 = vadd.f32 %v1401_v18, %v1308_v48 }
 0x7a1   :  { %v1430_v21 = vmax.f32 %v1402_v51, 0.0 }
 0x7a4   :  { %v1420_v63 = vpop.f32.mrf.mxu2 }
 0x7a5   :  { %v1421_v4 = vadd.f32 %v1420_v63, %v1309_v20 }
 0x7a6   :  { %v1403_v19 = vpop.f32.mrf.mxu1 }
 0x7a7   :  { %v1404_v17 = vadd.f32 %v1403_v19, %v1308_v48  ;;  %v1431_v24 = vmax.f32 %v1421_v4, 0.0  ;;  %v2173_v4 = vld [vmem:[#allocation12 + $0x18] sm:$0xff] }
 0x7a9   :  { %v1432_v54 = vmax.f32 %v1404_v17, 0.0  ;;  %v2176_v17 = vld [vmem:[#allocation12 + $0x30] sm:$0xff] }
 0x7ab   :  { %v1438_v45 = vpack.c.bf16 %v1432_v54, %v1430_v21  ;;  %v2175_v21 = vld [vmem:[#allocation12 + $0x28] sm:$0xff]  ;;  %v2174_v54 = vld [vmem:[#allocation12 + $0x20] sm:$0xff] }
 0x7ac   :  { %v1422_v30 = vpop.f32.mrf.mxu2 }
 0x7ad   :  { %v1423_v23 = vadd.f32 %v1422_v30, %v1309_v20  ;;  %1579 = vmatmul.bf16.vlgmr.msra.gmra.mxu3 %v1438_v45  ;;  %v2172_v45 = vld [vmem:[#allocation12 + $0x10] sm:$0xff]  ;;  %v2171_v30 = vld [vmem:[#allocation12 + $0x8] sm:$0xff] }
 0x7af   :  { %v1433_v22 = vmax.f32 %v1423_v23, 0.0 }
 0x7b1   :  { %v1439_v27 = vpack.c.bf16 %v1433_v22, %v1431_v24  ;;  %v2170_v22 = vld [vmem:[#allocation12] sm:$0xff] }
 0x7b3   :  { %1598 = vmatmul.bf16.vlgmr.msra.gmra.mxu0 %v1439_v27 }
 0x7cf   :  { %v1406_v60 = vpop.f32.mrf.mxu1 }
 0x7d0   :  { %v1407_v28 = vadd.f32 %v1406_v60, %v1308_v48 }
 0x7d2   :  { %v1434_v32 = vmax.f32 %v1407_v28, 0.0 }
 0x7d5   :  { %v1425_v10 = vpop.f32.mrf.mxu2 }
 0x7d6   :  { %v1426_v56 = vadd.f32 %v1425_v10, %v1309_v20 }
 0x7d7   :  { %v1408_v29 = vpop.f32.mrf.mxu1 }
 0x7d8   :  { %v1409_v2 = vadd.f32 %v1408_v29, %v1308_v48  ;;  %v1435_v36 = vmax.f32 %v1426_v56, 0.0 }
 0x7da   :  { %v1436_v1 = vmax.f32 %v1409_v2, 0.0 }
 0x7dc   :  { %v1440_v3 = vpack.c.bf16 %v1436_v1, %v1434_v32 }
 0x7dd   :  { %v1427_v46 = vpop.f32.mrf.mxu2 }
 0x7de   :  { %v1428_v35 = vadd.f32 %v1427_v46, %v1309_v20  ;;  %1584 = vmatmul.bf16.gmra.mxu3 %v1440_v3  ;;  %v2177_v20 = vld [vmem:[#allocation12 + $0x38] sm:$0xff] }
 0x7df   :  { %1770 = vmatpush.bf16.msra.mxu1 %v2177_v20 }
 0x7e0   :  { %v1437_v39 = vmax.f32 %v1428_v35, 0.0 }
 0x7e2   :  { %v1441_v40 = vpack.c.bf16 %v1437_v39, %v1435_v36 }
 0x7e3   :  { %1771 = vmatpush.bf16.msra.mxu1 %v2176_v17 }
 0x7e4   :  { %1603 = vmatmul.bf16.gmra.mxu0 %v1441_v40 }
 0x7e7   :  { %1772 = vmatpush.bf16.msra.mxu1 %v2175_v21 }
 0x7eb   :  { %1773 = vmatpush.bf16.msra.mxu1 %v2174_v54  ;;  %v1721_v54 = vperm.slane %v2883_v7, 6 }
 0x7ef   :  { %1774 = vmatpush.bf16.msra.mxu1 %v2173_v4 }
 0x7f3   :  { %1775 = vmatpush.bf16.msra.mxu1 %v2172_v45 }
 0x7f7   :  { %1776 = vmatpush.bf16.msra.mxu1 %v2171_v30 }
 0x7fb   :  { %1777 = vmatpush.bf16.msra.mxu1 %v2170_v22 }
 0x830   :  { %v1580_v43 = vpop.f32.mrf.mxu3  ;;  %v1599_v26 = vpop.f32.mrf.mxu0 }
 0x831   :  { %v1581_v38 = vadd.f32 %v1580_v43, %v1474_v41 }
 0x833   :  { %v1600_v44 = vadd.f32 %v1599_v26, %v1581_v38  ;;  %v1693_v26 = vperm.slane %v2883_v7, 4 }
 0x835   :  { %v1609_v33 = vadd.f32 %v1600_v44, %v2926_v50 }
 0x837   :  { %1613 = vadd.xlane.f32.xlu0 %v1609_v33 }
 0x838   :  { %v1582_v34 = vpop.f32.mrf.mxu3  ;;  %v1601_v47 = vpop.f32.mrf.mxu0 }
 0x839   :  { %v1583_v14 = vadd.f32 %v1582_v34, %v1474_v41 }
 0x83b   :  { %v1602_v31 = vadd.f32 %v1601_v47, %v1583_v14  ;;  %v1698_v14 = vperm.slane %v2883_v7, 5 }
 0x83d   :  { %v1610_v37 = vadd.f32 %v1602_v31, %v2928_v25 }
 0x83f   :  { %1615 = vadd.xlane.f32.xlu2 %v1610_v37 }
 0x861   :  { %v1585_v49 = vpop.f32.mrf.mxu3  ;;  %v1604_v53 = vpop.f32.mrf.mxu0 }
 0x862   :  { %v1586_v52 = vadd.f32 %v1585_v49, %v1474_v41 }
 0x864   :  { %v1605_v55 = vadd.f32 %v1604_v53, %v1586_v52 }
 0x866   :  { %v1611_v58 = vadd.f32 %v1605_v55, %v2936_v62 }
 0x868   :  { %1617 = vadd.xlane.f32.xlu1 %v1611_v58 }
 0x869   :  { %v1587_v59 = vpop.f32.mrf.mxu3  ;;  %v1606_v61 = vpop.f32.mrf.mxu0 }
 0x86a   :  { %v1588_v42 = vadd.f32 %v1587_v59, %v1474_v41 }
 0x86c   :  { %v1607_v8 = vadd.f32 %v1606_v61, %v1588_v42 }
 0x86e   :  { %v1612_v50 = vadd.f32 %v1607_v8, %v2938_v0 }
 0x870   :  { %1619 = vadd.xlane.f32.xlu0 %v1612_v50 }
 0x8aa   :  { %v1614_v5 = vpop.xlane.xlu0 %1613 }
 0x8ab   :  { %v1621_v6 = vmul.f32 %v1614_v5, %v2898_v57 }
 0x8ad   :  { %v1625_v13 = vsub.f32 %v1609_v33, %v1621_v6 }
 0x8af   :  { %v1629_v25 = vmul.f32 %v1625_v13, %v1625_v13 }
 0x8b1   :  { %1633 = vadd.xlane.f32.xlu2 %v1629_v25 }
 0x8b2   :  { %v1616_v9 = vpop.xlane.xlu2 %1615 }
 0x8b3   :  { %v1622_v11 = vmul.f32 %v1616_v9, %v2898_v57 }
 0x8b5   :  { %v1626_v12 = vsub.f32 %v1610_v37, %v1622_v11 }
 0x8b7   :  { %v1630_v15 = vmul.f32 %v1626_v12, %v1626_v12 }
 0x8b9   :  { %1635 = vadd.xlane.f32.xlu1 %v1630_v15 }
 0x8db   :  { %v1618_v62 = vpop.xlane.xlu1 %1617 }
 0x8dc   :  { %v1623_v16 = vmul.f32 %v1618_v62, %v2898_v57 }
 0x8de   :  { %v2950_v18 = vsub.f32 %v1611_v58, %v1623_v16 }
 0x8e0   :  { %v1631_v0 = vmul.f32 %v2950_v18, %v2950_v18 }
 0x8e2   :  { %1637 = vadd.xlane.f32.xlu0 %v1631_v0 }
 0x8e3   :  { %v1620_v48 = vpop.xlane.xlu0 %1619 }
 0x8e4   :  { %v1624_v63 = vmul.f32 %v1620_v48, %v2898_v57 }
 0x8e6   :  { %v2955_v51 = vsub.f32 %v1612_v50, %v1624_v63 }
 0x8e8   :  { %v1632_v19 = vmul.f32 %v2955_v51, %v2955_v51 }
 0x8ea   :  { %1639 = vadd.xlane.f32.xlu2 %v1632_v19 }
 0x924   :  { %v1634_v23 = vpop.xlane.xlu2 %1633 }
 0x925   :  { %v1641_v24 = vmul.f32 %v1634_v23, %v2898_v57 }
 0x927   :  { %v1645_v27 = vadd.f32 1e-05, %v1641_v24 }
 0x929   :  { %2300 = vrsqrt.f32 %v1645_v27  ;;  %vm1655_vm2 = vweird.f32 %v1645_v27 }
 0x92c   :  { %v1636_v60 = vpop.xlane.xlu1 %1635 }
 0x92d   :  { %v1642_v10 = vmul.f32 %v1636_v60, %v2898_v57 }
 0x92f   :  { %v2301_v28 = vpop.eup %2300  ;;  %v1646_v29 = vadd.f32 1e-05, %v1642_v10 }
 0x930   :  { %v1650_v2 = vmul.f32 %v2301_v28, %v1645_v27  ;;  %vm1656_vm1 = vweird.f32 %v2301_v28 }
 0x931   :  { %2302 = vrsqrt.f32 %v1646_v29  ;;  %vm1657_vm3 = vmor %vm1655_vm2, %vm1656_vm1  ;;  %vm1665_vm5 = vweird.f32 %v1646_v29 }
 0x932   :  { %v1651_v32 = vmul.f32 %v2301_v28, %v1650_v2 }
 0x934   :  { %v1652_v1 = vmul.f32 0.5, %v1651_v32 }
 0x936   :  { %v1653_v56 = vsub.f32 1.5, %v1652_v1 }
 0x937   :  { %v2303_v3 = vpop.eup %2302 }
 0x938   :  { %v1654_v46 = vmul.f32 %v2301_v28, %v1653_v56  ;;  %v1660_v35 = vmul.f32 %v2303_v3, %v1646_v29  ;;  %vm1666_vm4 = vweird.f32 %v2303_v3 }
 0x939   :  { %vm1667_vm6 = vmor %vm1665_vm5, %vm1666_vm4 }
 0x93a   :  { %v1661_v36 = vmul.f32 %v2303_v3, %v1660_v35  ;;  %v1658_v39 = vsel %vm1657_vm3, %v2301_v28, %v1654_v46 }
 0x93b   :  { %v1689_v43 = vmul.f32 %v1658_v39, %v1625_v13 }
 0x93c   :  { %v1662_v40 = vmul.f32 0.5, %v1661_v36 }
 0x93d   :  { %v1694_v34 = vmul.f32 %v1693_v26, %v1689_v43 }
 0x93e   :  { %v1663_v41 = vsub.f32 1.5, %v1662_v40 }
 0x93f   :  { %v1699_v31 = vadd.f32 %v1698_v14, %v1694_v34 }
 0x940   :  { %v1664_v38 = vmul.f32 %v2303_v3, %v1663_v41 }
 0x942   :  { %v1668_v44 = vsel %vm1667_vm6, %v2303_v3, %v1664_v38 }
 0x943   :  { %v1690_v33 = vmul.f32 %v1668_v44, %v1626_v12 }
 0x945   :  { %v1695_v47 = vmul.f32 %v1693_v26, %v1690_v33 }
 0x947   :  { %v1700_v37 = vadd.f32 %v1698_v14, %v1695_v47 }
 0x949   :  { %v1703_v49 = vpack.c.bf16 %v1700_v37, %v1699_v31 }
 0x94b   :  { %1778 = vmatmul.bf16.vlgmr.msra.gmra.mxu1 %v1703_v49 }
 0x955   :  { %v1638_v53 = vpop.xlane.xlu0 %1637 }
 0x956   :  { %v1643_v52 = vmul.f32 %v1638_v53, %v2898_v57 }
 0x958   :  { %v1647_v55 = vadd.f32 1e-05, %v1643_v52 }
 0x95a   :  { %2304 = vrsqrt.f32 %v1647_v55  ;;  %vm1675_vm8 = vweird.f32 %v1647_v55 }
 0x95d   :  { %v1640_v58 = vpop.xlane.xlu2 %1639 }
 0x95e   :  { %v1644_v59 = vmul.f32 %v1640_v58, %v2898_v57 }
 0x960   :  { %v2305_v42 = vpop.eup %2304  ;;  %v1648_v61 = vadd.f32 1e-05, %v1644_v59 }
 0x961   :  { %v1670_v8 = vmul.f32 %v2305_v42, %v1647_v55  ;;  %vm1676_vm7 = vweird.f32 %v2305_v42 }
 0x962   :  { %2306 = vrsqrt.f32 %v1648_v61  ;;  %vm1677_vm9 = vmor %vm1675_vm8, %vm1676_vm7  ;;  %vm1685_vm11 = vweird.f32 %v1648_v61 }
 0x963   :  { %v1671_v50 = vmul.f32 %v2305_v42, %v1670_v8 }
 0x965   :  { %v1672_v5 = vmul.f32 0.5, %v1671_v50 }
 0x967   :  { %v1673_v6 = vsub.f32 1.5, %v1672_v5 }
 0x968   :  { %v2307_v13 = vpop.eup %2306 }
 0x969   :  { %v1674_v25 = vmul.f32 %v2305_v42, %v1673_v6  ;;  %v1680_v9 = vmul.f32 %v2307_v13, %v1648_v61  ;;  %vm1686_vm10 = vweird.f32 %v2307_v13 }
 0x96a   :  { %vm1687_vm12 = vmor %vm1685_vm11, %vm1686_vm10 }
 0x96b   :  { %v1681_v11 = vmul.f32 %v2307_v13, %v1680_v9  ;;  %v1678_v15 = vsel %vm1677_vm9, %v2305_v42, %v1674_v25 }
 0x96c   :  { %v1691_v57 = vmul.f32 %v1678_v15, %v2950_v18 }
 0x96d   :  { %v1682_v12 = vmul.f32 0.5, %v1681_v11 }
 0x96e   :  { %v1696_v63 = vmul.f32 %v1693_v26, %v1691_v57 }
 0x96f   :  { %v1683_v62 = vsub.f32 1.5, %v1682_v12 }
 0x970   :  { %v1701_v20 = vadd.f32 %v1698_v14, %v1696_v63 }
 0x971   :  { %v1684_v16 = vmul.f32 %v2307_v13, %v1683_v62 }
 0x973   :  { %v1688_v0 = vsel %vm1687_vm12, %v2307_v13, %v1684_v16 }
 0x974   :  { %v1692_v48 = vmul.f32 %v1688_v0, %v2955_v51 }
 0x976   :  { %v1697_v19 = vmul.f32 %v1693_v26, %v1692_v48 }
 0x978   :  { %v1702_v17 = vadd.f32 %v1698_v14, %v1697_v19 }
 0x97a   :  { %v1704_v21 = vpack.c.bf16 %v1702_v17, %v1701_v20 }
 0x97c   :  { %1783 = vmatmul.bf16.gmra.mxu1 %v1704_v21 }
 0x9c8   :  { %v1779_v4 = vpop.f32.mrf.mxu1 }
 0x9c9   :  { %v1780_v45 = vadd.f32 %v1779_v4, %v1721_v54 }
 0x9cb   :  { %1789 = vst [vmem:[%s2990_s10] sm:$0xff] %v1780_v45 }
 0x9d0   :  { %v1781_v18 = vpop.f32.mrf.mxu1 }
 0x9d1   :  { %v1782_v30 = vadd.f32 %v1781_v18, %v1721_v54 }
 0x9d3   :  { %1790 = vst [vmem:[%s2990_s10 + $0x8] sm:$0xff] %v1782_v30 }
 0x9f9   :  { %v1784_v51 = vpop.f32.mrf.mxu1 }
 0x9fa   :  { %v1785_v23 = vadd.f32 %v1784_v51, %v1721_v54 }
 0x9fc   :  { %1791 = vst [vmem:[%s2990_s10 + $0x10] sm:$0xff] %v1785_v23 }
 0xa01   :  { %v1786_v24 = vpop.f32.mrf.mxu1 }
 0xa02   :  { %v1787_v7 = vadd.f32 %v1786_v24, %v1721_v54 }
 0xa04   :  { %1792 = vst [vmem:[%s2990_s10 + $0x18] sm:$0xff] %v1787_v7 }
 0xa05   :  { %1797 = vsyncpa [#allocation3], 1 }
 0xa06   :  { %1798 = vsyncpa [#allocation5], 1 }
 0xa07   :  { %1799 = vsyncpa [#allocation8], 1 }
 0xa08   :  { %1800 = vsyncpa [#allocation11], 1 }
 0xa09   :  { %1801 = vsyncpa [#allocation14], 1 }

</bundles_post_ra>
